<compile_context>
chip_gen: v6e
topology: v6e:2x2x1
jax: 0.10.0
libtpu: 0.0.40
codegen_flags: <defaults>
</compile_context>

<pallas_src>
import math

import jax
import jax.numpy as jnp
from jax.experimental import pallas as pl
from jax.experimental.pallas import tpu as pltpu


def _round_up(x, m):
    return (x + m - 1) // m * m


def _pick_class_tile(dim, K, cNp, fc_tile_bytes=4 * 1024 * 1024):
    """Largest multiple of 128 dividing cNp whose bf16 fc tile fits the budget."""
    best = 128
    for t in range(128, cNp + 1, 128):
        if cNp % t == 0 and dim * K * t * 2 <= fc_tile_bytes:
            best = t
    return best


def make_multi_softtriple_kernel(B, dim, cN, K, TCN, n_class_tiles, use_reg):
    """Pallas kernel: one (sub-loss, class-tile) step per grid point."""
    inv_B = 1.0 / float(B)
    reg_denom = 1.0 / float(cN * K * max(K - 1, 1))
    NEG = -1e30

    def kernel(params_ref, x_ref, fc_ref, bias_ref, tgt_ref,
               loss_ref, logit_ref, m_sc, l_sc, t_sc, reg_sc):
        i = pl.program_id(0)           # sub-loss index
        j = pl.program_id(1)           # class-tile index
        la = params_ref[i, 0]          # logit scale
        gamma_inv = params_ref[i, 1]   # 1 / gamma
        tau = params_ref[i, 2]         # regularizer weight
        margin = params_ref[i, 3]

        @pl.when(j == 0)
        def _init():
            m_sc[...] = jnp.full_like(m_sc, NEG)
            l_sc[...] = jnp.zeros_like(l_sc)
            t_sc[...] = jnp.zeros_like(t_sc)
            reg_sc[...] = jnp.zeros_like(reg_sc)

        x = x_ref[0]                   # (B, dim)  f32
        tgt = tgt_ref[0]               # (B, 1)    int32

        # L2 normalization of the input (F.normalize, eps=1e-12), f32 math.
        xn = x * jax.lax.rsqrt(
            jnp.maximum(jnp.sum(x * x, axis=1, keepdims=True), 1e-24))
        xn_bf = xn.astype(jnp.bfloat16)

        # Similarity to the K sub-centers of this class tile.  Centers are
        # pre-normalized bf16 (static weights), so fc feeds the MXU directly
        # with f32 accumulation; no normalized-centers temporary exists.
        sims = []
        for k in range(K):
            s = jnp.dot(xn_bf, fc_ref[0, k],
                        preferred_element_type=jnp.float32)       # (B, TCN)
            sims.append(s + bias_ref[0, k])

        # Grouped softmax over the K sub-centers with a per-class (per-group)
        # max, computed per K-slice (no full (B, K*cNp) temporaries).
        gmax = sims[0] * gamma_inv
        for k in range(1, K):
            gmax = jnp.maximum(gmax, sims[k] * gamma_inv)
        gsum = jnp.zeros((B, TCN), jnp.float32)
        wsum = jnp.zeros((B, TCN), jnp.float32)
        for k in range(K):
            e = jnp.exp(sims[k] * gamma_inv - gmax)
            gsum = gsum + e
            wsum = wsum + e * sims[k]
        simClass = wsum / gsum          # (B, TCN); pad lanes are exactly 0

        logit_ref[0] = simClass         # lane-dense tile writeback

        # Margin cross-entropy over the real classes, online LSE across tiles.
        col0 = j * TCN
        class_ids = jax.lax.broadcasted_iota(jnp.int32, (B, TCN), 1) + col0
        onehot = (class_ids == tgt).astype(jnp.float32)
        logits = la * (simClass - margin * onehot)
        logits = jnp.where(class_ids < cN, logits, NEG)

        m_prev = m_sc[...]
        m_new = jnp.maximum(m_prev, jnp.max(logits, axis=1, keepdims=True))
        l_sc[...] = (l_sc[...] * jnp.exp(m_prev - m_new)
                     + jnp.sum(jnp.exp(logits - m_new), axis=1, keepdims=True))
        m_sc[...] = m_new
        t_sc[...] = t_sc[...] + jnp.sum(onehot * logits, axis=1, keepdims=True)

        if use_reg:
            # Block-diagonal center regularizer: only within-class sub-center
            # pairs of this class tile; (dim, TCN) VPU multiplies, f32 accum,
            # accumulated lane-wise across class tiles in VMEM scratch.
            cvalid = (jax.lax.broadcasted_iota(jnp.int32, (1, TCN), 1) + col0
                      < cN).astype(jnp.float32)
            acc = jnp.zeros((1, TCN), jnp.float32)
            for k1 in range(K):
                c1 = fc_ref[0, k1].astype(jnp.float32)
                for k2 in range(k1 + 1, K):
                    c2 = fc_ref[0, k2].astype(jnp.float32)
                    g = jnp.sum(c1 * c2, axis=0, keepdims=True)   # (1, TCN)
                    acc = acc + jnp.sqrt(
                        jnp.maximum(2.0 + 1e-5 - 2.0 * g, 0.0))
            reg_sc[...] = reg_sc[...] + acc * cvalid

        @pl.when(j == n_class_tiles - 1)
        def _finalize():
            lse = m_sc[...] + jnp.log(l_sc[...])                  # (B, 1)
            loss = jnp.sum(lse - t_sc[...]) * inv_B
            if use_reg:
                loss = loss + tau * (jnp.sum(reg_sc[...]) * reg_denom)
            loss_ref[...] = jnp.full((1, 1, 128), loss, dtype=jnp.float32)

    return kernel


def multi_softtriple_bias_forward(params, x, tgt, fc_stack, bias_stack, *,
                                  cN, cNp, K, use_reg):
    """Runs all stacked sub-losses in a single pallas_call.

    params     : (plen, 4) f32   [la, 1/gamma, tau, margin] per sub-loss (SMEM)
    x          : (plen, B, dim)  f32
    tgt        : (plen, B, 1)    int32
    fc_stack   : (plen, K, dim, cNp) bf16  pre-normalized, class-padded
    bias_stack : (plen, K, 1, cNp)   f32
    Returns (losses (plen,), logits (plen, B, cN)).
    """
    plen, B, dim = x.shape
    TCN = _pick_class_tile(dim, K, cNp)
    nct = cNp // TCN

    kernel = make_multi_softtriple_kernel(B, dim, cN, K, TCN, nct, use_reg)

    # Explicit VMEM budget: double-buffered blocks + in-kernel f32 temporaries.
    blk_bytes = (dim * K * TCN * 2      # fc tile (bf16)
                 + K * TCN * 4          # bias tile
                 + B * dim * 4          # x
                 + B * 4                # target
                 + B * TCN * 4          # logits out tile
                 + 128 * 4)             # loss out
    tmp_bytes = (3 * K + 8) * B * TCN * 4 + 2 * dim * TCN * 4
    vmem_limit = int(min(max(2 * blk_bytes + tmp_bytes, 24 * 2**20), 48 * 2**20))

    losses, logits = pl.pallas_call(
        kernel,
        out_shape=(jax.ShapeDtypeStruct((plen, 1, 128), jnp.float32),
                   jax.ShapeDtypeStruct((plen, B, cNp), jnp.float32)),
        grid=(plen, nct),
        in_specs=[
            # Per-loss scalar parameters live whole in SMEM.
            pl.BlockSpec(memory_space=pltpu.MemorySpace.SMEM),
            pl.BlockSpec((1, B, dim), lambda i, j: (i, 0, 0)),
            pl.BlockSpec((1, K, dim, TCN), lambda i, j: (i, 0, 0, j)),
            pl.BlockSpec((1, K, 1, TCN), lambda i, j: (i, 0, 0, j)),
            pl.BlockSpec((1, B, 1), lambda i, j: (i, 0, 0)),
        ],
        out_specs=(
            pl.BlockSpec((1, 1, 128), lambda i, j: (i, 0, 0)),
            pl.BlockSpec((1, B, TCN), lambda i, j: (i, 0, j)),
        ),
        scratch_shapes=[
            pltpu.VMEM((B, 1), jnp.float32),     # running max
            pltpu.VMEM((B, 1), jnp.float32),     # running sum-exp
            pltpu.VMEM((B, 1), jnp.float32),     # target logit
            pltpu.VMEM((1, TCN), jnp.float32),   # regularizer lane accumulator
        ],
        compiler_params=pltpu.CompilerParams(
            dimension_semantics=("parallel", "arbitrary"),
            vmem_limit_bytes=vmem_limit),
    )(params, x, fc_stack, bias_stack, tgt)

    return losses[:, 0, 0], logits[:, :, :cN]


class MultiSoftTripleBias:
    """JAX/Pallas port of MultiSoftTriple_bias (return_class_info=False path)."""

    def __init__(self, loss_weight, key, **kwargs):
        self.loss_weight = [float(w) for w in loss_weight]
        plen = len(loss_weight)
        kwargs = dict(kwargs)
        for k in kwargs:
            if not isinstance(kwargs[k], list):
                kwargs[k] = [kwargs[k]] * plen

        self.args = []
        self.params = []    # [la, 1/gamma, tau, margin] per sub-loss
        self.fcs = []       # (K, dim, cNp) bf16, pre-normalized, class-padded
        self.biases = []    # (K, 1, cNp)   f32
        for i in range(plen):
            args = {k: kwargs[k][i] for k in kwargs}
            dim, cN, K = args["dim"], args["cN"], args["K"]
            C = cN * K
            cNp = _round_up(cN, 128)
            args["cNp"] = cNp
            key, k1, k2 = jax.random.split(key, 3)
            # kaiming_uniform_(a=sqrt(5)) on a (dim, C) tensor -> fan_in = C,
            # bound = sqrt(6 / ((1 + 5) * C)) = 1 / sqrt(C)
            bound = 1.0 / math.sqrt(C)
            fc = jax.random.uniform(k1, (dim, C), jnp.float32, -bound, bound)
            b = jax.random.uniform(k2, (C,), jnp.float32, -0.1, 0.1)
            # Centers are L2-normalized once here in f32 (weights are static in
            # this forward-only port) and stored in bf16 -> the kernel feeds fc
            # straight to the MXU with no per-call normalization and half the
            # HBM traffic.  Column c*K + k of the canonical layout maps to
            # fc_r[k, :, c]; class index on the lane axis, zero-padded to 128.
            fcn = fc * jax.lax.rsqrt(
                jnp.maximum(jnp.sum(fc * fc, axis=0, keepdims=True), 1e-24))
            fc_r = jnp.transpose(fcn.reshape(dim, cN, K), (2, 0, 1))
            fc_r = jnp.pad(fc_r, ((0, 0), (0, 0), (0, cNp - cN)))
            b_r = jnp.pad(jnp.transpose(b.reshape(cN, K), (1, 0)),
                          ((0, 0), (0, cNp - cN)))[:, None, :]
            self.args.append(args)
            self.params.append([float(args["la"]), 1.0 / float(args["gamma"]),
                                float(args["tau"]), float(args["margin"])])
            self.fcs.append(fc_r.astype(jnp.bfloat16))
            self.biases.append(b_r.astype(jnp.float32))

    def __call__(self, input, target, att_maps=None, return_class_info=False):
        # TODO(synk): att_maps and the return_class_info=True branch are not
        # implemented (they only re-expose intermediates of the default path).
        a0 = self.args[0]
        uniform = all((a["dim"], a["cN"], a["K"]) ==
                      (a0["dim"], a0["cN"], a0["K"]) for a in self.args)
        if uniform:
            losses, logits = multi_softtriple_bias_forward(
                jnp.asarray(self.params, jnp.float32),
                jnp.asarray(input, jnp.float32),
                jnp.asarray(target, jnp.int32)[..., None],
                jnp.stack(self.fcs, axis=0),
                jnp.stack(self.biases, axis=0),
                cN=a0["cN"], cNp=a0["cNp"], K=a0["K"],
                use_reg=(a0["K"] > 1 and any(a["tau"] > 0 for a in self.args)))
        else:
            # Heterogeneous sub-loss shapes: run each sub-loss as a plen=1 call.
            loss_list, logit_list = [], []
            for idx, a in enumerate(self.args):
                li, lg = multi_softtriple_bias_forward(
                    jnp.asarray([self.params[idx]], jnp.float32),
                    jnp.asarray(input[idx], jnp.float32)[None],
                    jnp.asarray(target[idx], jnp.int32)[None, :, None],
                    self.fcs[idx][None],
                    self.biases[idx][None],
                    cN=a["cN"], cNp=a["cNp"], K=a["K"],
                    use_reg=(a["K"] > 1 and a["tau"] > 0))
                loss_list.append(li[0])
                logit_list.append(lg[0])
            losses = jnp.stack(loss_list, axis=0)
            logits = jnp.stack(logit_list, axis=0)

        w = jnp.asarray(self.loss_weight, jnp.float32)
        final_loss = jnp.sum(losses * w) / float(sum(self.loss_weight))
        return final_loss, logits


if __name__ == "__main__":
    key = jax.random.PRNGKey(0)
    plen, B, dim, cN, K = 2, 8, 32, 8, 4

    key, kx, kt, km = jax.random.split(key, 4)
    x = jax.random.normal(kx, (plen, B, dim), dtype=jnp.float32)
    target = jax.random.randint(kt, (plen, B), 0, cN, dtype=jnp.int32)

    model = MultiSoftTripleBias(
        loss_weight=[1.0, 0.5], key=km,
        la=20.0, gamma=0.1, tau=0.2, margin=0.01,
        dim=dim, cN=cN, K=K)

    loss, logits = model(x, target)
    loss, logits = jax.block_until_ready((loss, logits))

    assert logits.shape == (plen, B, cN), logits.shape
    assert bool(jnp.isfinite(loss))
    assert bool(jnp.all(jnp.isfinite(logits)))
    print("KERNEL_OK")
</pallas_src>

<mosaic_0001>
module attributes {stable_mosaic.version = 11 : i64} {
  func.func @kernel(%arg0: i32, %arg1: i32, %arg2: memref<2x4xf32, #tpu.memory_space<smem>>, %arg3: memref<1x8x32xf32, #tpu.memory_space<vmem>>, %arg4: memref<1x4x32x128xbf16, #tpu.memory_space<vmem>>, %arg5: memref<1x4x1x128xf32, #tpu.memory_space<vmem>>, %arg6: memref<1x8x1xi32, #tpu.memory_space<vmem>>, %arg7: memref<1x1x128xf32, #tpu.memory_space<vmem>>, %arg8: memref<1x8x128xf32, #tpu.memory_space<vmem>>, %arg9: memref<8x1xf32, #tpu.memory_space<vmem>>, %arg10: memref<8x1xf32, #tpu.memory_space<vmem>>, %arg11: memref<8x1xf32, #tpu.memory_space<vmem>>, %arg12: memref<1x128xf32, #tpu.memory_space<vmem>>) attributes {dimension_semantics = [#tpu.dimension_semantics<parallel>, #tpu.dimension_semantics<arbitrary>], iteration_bounds = array<i64: 2, 1>, scalar_prefetch = 0 : i64, scratch_operands = 4 : i64, tpu.core_type = #tpu.core_type<tc>, window_params = [{transform_indices = @transform_0, window_bounds = array<i64: 2, 4>}, {transform_indices = @transform_1, window_bounds = array<i64: 1, 8, 32>}, {transform_indices = @transform_2, window_bounds = array<i64: 1, 4, 32, 128>}, {transform_indices = @transform_3, window_bounds = array<i64: 1, 4, 1, 128>}, {transform_indices = @transform_4, window_bounds = array<i64: 1, 8, 1>}, {transform_indices = @transform_5, window_bounds = array<i64: 1, 1, 128>}, {transform_indices = @transform_6, window_bounds = array<i64: 1, 8, 128>}]} {
    %0 = arith.index_cast %arg0 : i32 to index
    %c0 = arith.constant 0 : index
    %1 = memref.load %arg2[%0, %c0] : memref<2x4xf32, #tpu.memory_space<smem>>
    %2 = arith.index_cast %arg0 : i32 to index
    %c1 = arith.constant 1 : index
    %3 = memref.load %arg2[%2, %c1] : memref<2x4xf32, #tpu.memory_space<smem>>
    %4 = arith.index_cast %arg0 : i32 to index
    %c2 = arith.constant 2 : index
    %5 = memref.load %arg2[%4, %c2] : memref<2x4xf32, #tpu.memory_space<smem>>
    %6 = arith.index_cast %arg0 : i32 to index
    %c3 = arith.constant 3 : index
    %7 = memref.load %arg2[%6, %c3] : memref<2x4xf32, #tpu.memory_space<smem>>
    %c0_i32 = arith.constant 0 : i32
    %8 = arith.cmpi eq, %arg1, %c0_i32 : i32
    %9 = arith.extui %8 : i1 to i32
    %c0_i32_0 = arith.constant 0 : i32
    %10 = arith.cmpi ne, %9, %c0_i32_0 : i32
    scf.if %10 {
      %cst_133 = arith.constant -1.000000e+30 : f32
      %244 = vector.broadcast %cst_133 : f32 to vector<8x1xf32>
      %c0_134 = arith.constant 0 : index
      %c0_135 = arith.constant 0 : index
      %245 = vector.load %arg9[%c0_134, %c0_135] : memref<8x1xf32, #tpu.memory_space<vmem>>, vector<8x1xf32>
      tpu.vector_store %arg9[%c0_134, %c0_135], %244 {strides = array<i32>} : memref<8x1xf32, #tpu.memory_space<vmem>>, vector<8x1xf32>,
      %cst_136 = arith.constant 0.000000e+00 : f32
      %246 = vector.broadcast %cst_136 : f32 to vector<8x1xf32>
      %c0_137 = arith.constant 0 : index
      %c0_138 = arith.constant 0 : index
      %247 = vector.load %arg10[%c0_137, %c0_138] : memref<8x1xf32, #tpu.memory_space<vmem>>, vector<8x1xf32>
      tpu.vector_store %arg10[%c0_137, %c0_138], %246 {strides = array<i32>} : memref<8x1xf32, #tpu.memory_space<vmem>>, vector<8x1xf32>,
      %cst_139 = arith.constant 0.000000e+00 : f32
      %248 = vector.broadcast %cst_139 : f32 to vector<8x1xf32>
      %c0_140 = arith.constant 0 : index
      %c0_141 = arith.constant 0 : index
      %249 = vector.load %arg11[%c0_140, %c0_141] : memref<8x1xf32, #tpu.memory_space<vmem>>, vector<8x1xf32>
      tpu.vector_store %arg11[%c0_140, %c0_141], %248 {strides = array<i32>} : memref<8x1xf32, #tpu.memory_space<vmem>>, vector<8x1xf32>,
      %cst_142 = arith.constant 0.000000e+00 : f32
      %250 = vector.broadcast %cst_142 : f32 to vector<1x128xf32>
      %c0_143 = arith.constant 0 : index
      %c0_144 = arith.constant 0 : index
      %251 = vector.load %arg12[%c0_143, %c0_144] : memref<1x128xf32, #tpu.memory_space<vmem>>, vector<1x128xf32>
      tpu.vector_store %arg12[%c0_143, %c0_144], %250 {strides = array<i32>} : memref<1x128xf32, #tpu.memory_space<vmem>>, vector<1x128xf32>,
    } else {
    }
    %c0_1 = arith.constant 0 : index
    %c0_2 = arith.constant 0 : index
    %c0_3 = arith.constant 0 : index
    %11 = vector.load %arg3[%c0_1, %c0_2, %c0_3] : memref<1x8x32xf32, #tpu.memory_space<vmem>>, vector<1x8x32xf32>
    %12 = vector.shape_cast %11 : vector<1x8x32xf32> to vector<8x32xf32>
    %c0_4 = arith.constant 0 : index
    %c0_5 = arith.constant 0 : index
    %c0_6 = arith.constant 0 : index
    %13 = vector.load %arg6[%c0_4, %c0_5, %c0_6] : memref<1x8x1xi32, #tpu.memory_space<vmem>>, vector<1x8x1xi32>
    %14 = vector.shape_cast %13 : vector<1x8x1xi32> to vector<8x1xi32>
    %15 = arith.mulf %12, %12 : vector<8x32xf32>
    %cst = arith.constant dense<0.000000e+00> : vector<8xf32>
    %16 = vector.multi_reduction <add>, %15, %cst [1] : vector<8x32xf32> to vector<8xf32>
    %17 = vector.shape_cast %16 : vector<8xf32> to vector<8x1xf32>
    %cst_7 = arith.constant 1.000000e-24 : f32
    %18 = vector.broadcast %cst_7 : f32 to vector<8x1xf32>
    %19 = arith.maximumf %17, %18 : vector<8x1xf32>
    %20 = math.rsqrt %19 : vector<8x1xf32>
    %21 = vector.broadcast %20 : vector<8x1xf32> to vector<8x32xf32>
    %22 = arith.mulf %12, %21 : vector<8x32xf32>
    %23 = arith.truncf %22 : vector<8x32xf32> to vector<8x32xbf16>
    %c0_8 = arith.constant 0 : index
    %c0_9 = arith.constant 0 : index
    %c0_10 = arith.constant 0 : index
    %c0_11 = arith.constant 0 : index
    %24 = vector.load %arg4[%c0_8, %c0_9, %c0_10, %c0_11] : memref<1x4x32x128xbf16, #tpu.memory_space<vmem>>, vector<1x1x32x128xbf16>
    %25 = vector.shape_cast %24 : vector<1x1x32x128xbf16> to vector<32x128xbf16>
    %cst_12 = arith.constant dense<0.000000e+00> : vector<8x128xf32>
    %26 = tpu.matmul %23, %25, %cst_12 {dimension_numbers = #tpu.dot_dimension_numbers<[1], [0], [0], [1], [0, 0, 1, 1], [], []>} : vector<8x32xbf16>, vector<32x128xbf16>, vector<8x128xf32> -> vector<8x128xf32>
    %c0_13 = arith.constant 0 : index
    %c0_14 = arith.constant 0 : index
    %c0_15 = arith.constant 0 : index
    %c0_16 = arith.constant 0 : index
    %27 = vector.load %arg5[%c0_13, %c0_14, %c0_15, %c0_16] : memref<1x4x1x128xf32, #tpu.memory_space<vmem>>, vector<1x1x1x128xf32>
    %28 = vector.shape_cast %27 : vector<1x1x1x128xf32> to vector<1x128xf32>
    %29 = vector.broadcast %28 : vector<1x128xf32> to vector<8x128xf32>
    %30 = arith.addf %26, %29 : vector<8x128xf32>
    %c0_17 = arith.constant 0 : index
    %c1_18 = arith.constant 1 : index
    %c0_19 = arith.constant 0 : index
    %c0_20 = arith.constant 0 : index
    %31 = vector.load %arg4[%c0_17, %c1_18, %c0_19, %c0_20] : memref<1x4x32x128xbf16, #tpu.memory_space<vmem>>, vector<1x1x32x128xbf16>
    %32 = vector.shape_cast %31 : vector<1x1x32x128xbf16> to vector<32x128xbf16>
    %cst_21 = arith.constant dense<0.000000e+00> : vector<8x128xf32>
    %33 = tpu.matmul %23, %32, %cst_21 {dimension_numbers = #tpu.dot_dimension_numbers<[1], [0], [0], [1], [0, 0, 1, 1], [], []>} : vector<8x32xbf16>, vector<32x128xbf16>, vector<8x128xf32> -> vector<8x128xf32>
    %c0_22 = arith.constant 0 : index
    %c1_23 = arith.constant 1 : index
    %c0_24 = arith.constant 0 : index
    %c0_25 = arith.constant 0 : index
    %34 = vector.load %arg5[%c0_22, %c1_23, %c0_24, %c0_25] : memref<1x4x1x128xf32, #tpu.memory_space<vmem>>, vector<1x1x1x128xf32>
    %35 = vector.shape_cast %34 : vector<1x1x1x128xf32> to vector<1x128xf32>
    %36 = vector.broadcast %35 : vector<1x128xf32> to vector<8x128xf32>
    %37 = arith.addf %33, %36 : vector<8x128xf32>
    %c0_26 = arith.constant 0 : index
    %c2_27 = arith.constant 2 : index
    %c0_28 = arith.constant 0 : index
    %c0_29 = arith.constant 0 : index
    %38 = vector.load %arg4[%c0_26, %c2_27, %c0_28, %c0_29] : memref<1x4x32x128xbf16, #tpu.memory_space<vmem>>, vector<1x1x32x128xbf16>
    %39 = vector.shape_cast %38 : vector<1x1x32x128xbf16> to vector<32x128xbf16>
    %cst_30 = arith.constant dense<0.000000e+00> : vector<8x128xf32>
    %40 = tpu.matmul %23, %39, %cst_30 {dimension_numbers = #tpu.dot_dimension_numbers<[1], [0], [0], [1], [0, 0, 1, 1], [], []>} : vector<8x32xbf16>, vector<32x128xbf16>, vector<8x128xf32> -> vector<8x128xf32>
    %c0_31 = arith.constant 0 : index
    %c2_32 = arith.constant 2 : index
    %c0_33 = arith.constant 0 : index
    %c0_34 = arith.constant 0 : index
    %41 = vector.load %arg5[%c0_31, %c2_32, %c0_33, %c0_34] : memref<1x4x1x128xf32, #tpu.memory_space<vmem>>, vector<1x1x1x128xf32>
    %42 = vector.shape_cast %41 : vector<1x1x1x128xf32> to vector<1x128xf32>
    %43 = vector.broadcast %42 : vector<1x128xf32> to vector<8x128xf32>
    %44 = arith.addf %40, %43 : vector<8x128xf32>
    %c0_35 = arith.constant 0 : index
    %c3_36 = arith.constant 3 : index
    %c0_37 = arith.constant 0 : index
    %c0_38 = arith.constant 0 : index
    %45 = vector.load %arg4[%c0_35, %c3_36, %c0_37, %c0_38] : memref<1x4x32x128xbf16, #tpu.memory_space<vmem>>, vector<1x1x32x128xbf16>
    %46 = vector.shape_cast %45 : vector<1x1x32x128xbf16> to vector<32x128xbf16>
    %cst_39 = arith.constant dense<0.000000e+00> : vector<8x128xf32>
    %47 = tpu.matmul %23, %46, %cst_39 {dimension_numbers = #tpu.dot_dimension_numbers<[1], [0], [0], [1], [0, 0, 1, 1], [], []>} : vector<8x32xbf16>, vector<32x128xbf16>, vector<8x128xf32> -> vector<8x128xf32>
    %c0_40 = arith.constant 0 : index
    %c3_41 = arith.constant 3 : index
    %c0_42 = arith.constant 0 : index
    %c0_43 = arith.constant 0 : index
    %48 = vector.load %arg5[%c0_40, %c3_41, %c0_42, %c0_43] : memref<1x4x1x128xf32, #tpu.memory_space<vmem>>, vector<1x1x1x128xf32>
    %49 = vector.shape_cast %48 : vector<1x1x1x128xf32> to vector<1x128xf32>
    %50 = vector.broadcast %49 : vector<1x128xf32> to vector<8x128xf32>
    %51 = arith.addf %47, %50 : vector<8x128xf32>
    %52 = vector.broadcast %3 : f32 to vector<8x128xf32>
    %53 = arith.mulf %30, %52 : vector<8x128xf32>
    %54 = vector.broadcast %3 : f32 to vector<8x128xf32>
    %55 = arith.mulf %37, %54 : vector<8x128xf32>
    %56 = arith.maximumf %53, %55 : vector<8x128xf32>
    %57 = vector.broadcast %3 : f32 to vector<8x128xf32>
    %58 = arith.mulf %44, %57 : vector<8x128xf32>
    %59 = arith.maximumf %56, %58 : vector<8x128xf32>
    %60 = vector.broadcast %3 : f32 to vector<8x128xf32>
    %61 = arith.mulf %51, %60 : vector<8x128xf32>
    %62 = arith.maximumf %59, %61 : vector<8x128xf32>
    %cst_44 = arith.constant 0.000000e+00 : f32
    %63 = vector.broadcast %cst_44 : f32 to vector<8x128xf32>
    %cst_45 = arith.constant 0.000000e+00 : f32
    %64 = vector.broadcast %cst_45 : f32 to vector<8x128xf32>
    %65 = vector.broadcast %3 : f32 to vector<8x128xf32>
    %66 = arith.mulf %30, %65 : vector<8x128xf32>
    %67 = arith.subf %66, %62 : vector<8x128xf32>
    %68 = math.exp %67 : vector<8x128xf32>
    %69 = arith.addf %63, %68 : vector<8x128xf32>
    %70 = arith.mulf %68, %30 : vector<8x128xf32>
    %71 = arith.addf %64, %70 : vector<8x128xf32>
    %72 = vector.broadcast %3 : f32 to vector<8x128xf32>
    %73 = arith.mulf %37, %72 : vector<8x128xf32>
    %74 = arith.subf %73, %62 : vector<8x128xf32>
    %75 = math.exp %74 : vector<8x128xf32>
    %76 = arith.addf %69, %75 : vector<8x128xf32>
    %77 = arith.mulf %75, %37 : vector<8x128xf32>
    %78 = arith.addf %71, %77 : vector<8x128xf32>
    %79 = vector.broadcast %3 : f32 to vector<8x128xf32>
    %80 = arith.mulf %44, %79 : vector<8x128xf32>
    %81 = arith.subf %80, %62 : vector<8x128xf32>
    %82 = math.exp %81 : vector<8x128xf32>
    %83 = arith.addf %76, %82 : vector<8x128xf32>
    %84 = arith.mulf %82, %44 : vector<8x128xf32>
    %85 = arith.addf %78, %84 : vector<8x128xf32>
    %86 = vector.broadcast %3 : f32 to vector<8x128xf32>
    %87 = arith.mulf %51, %86 : vector<8x128xf32>
    %88 = arith.subf %87, %62 : vector<8x128xf32>
    %89 = math.exp %88 : vector<8x128xf32>
    %90 = arith.addf %83, %89 : vector<8x128xf32>
    %91 = arith.mulf %89, %51 : vector<8x128xf32>
    %92 = arith.addf %85, %91 : vector<8x128xf32>
    %93 = arith.divf %92, %90 : vector<8x128xf32>
    %c0_46 = arith.constant 0 : index
    %c0_47 = arith.constant 0 : index
    %c0_48 = arith.constant 0 : index
    %94 = vector.load %arg8[%c0_46, %c0_47, %c0_48] : memref<1x8x128xf32, #tpu.memory_space<vmem>>, vector<1x8x128xf32>
    %95 = vector.shape_cast %94 : vector<1x8x128xf32> to vector<8x128xf32>
    %96 = vector.shape_cast %93 : vector<8x128xf32> to vector<1x8x128xf32>
    tpu.vector_store %arg8[%c0_46, %c0_47, %c0_48], %96 {strides = array<i32>} : memref<1x8x128xf32, #tpu.memory_space<vmem>>, vector<1x8x128xf32>,
    %c128_i32 = arith.constant 128 : i32
    %97 = arith.muli %arg1, %c128_i32 : i32
    %98 = tpu.iota {dimensions = array<i32: 1>} : vector<8x128xi32>
    %99 = vector.broadcast %97 : i32 to vector<8x128xi32>
    %100 = arith.addi %98, %99 : vector<8x128xi32>
    %101 = vector.broadcast %14 : vector<8x1xi32> to vector<8x128xi32>
    %102 = arith.cmpi eq, %100, %101 : vector<8x128xi32>
    %103 = arith.extui %102 : vector<8x128xi1> to vector<8x128xi32>
    %104 = arith.sitofp %103 : vector<8x128xi32> to vector<8x128xf32>
    %105 = vector.broadcast %7 : f32 to vector<8x128xf32>
    %106 = arith.mulf %105, %104 : vector<8x128xf32>
    %107 = arith.subf %93, %106 : vector<8x128xf32>
    %108 = vector.broadcast %1 : f32 to vector<8x128xf32>
    %109 = arith.mulf %108, %107 : vector<8x128xf32>
    %c8_i32 = arith.constant 8 : i32
    %110 = vector.broadcast %c8_i32 : i32 to vector<8x128xi32>
    %111 = arith.cmpi slt, %100, %110 : vector<8x128xi32>
    %cst_49 = arith.constant -1.000000e+30 : f32
    %112 = vector.broadcast %cst_49 : f32 to vector<8x128xf32>
    %113 = arith.select %111, %109, %112 : vector<8x128xi1>, vector<8x128xf32>
    %c0_50 = arith.constant 0 : index
    %c0_51 = arith.constant 0 : index
    %114 = vector.load %arg9[%c0_50, %c0_51] : memref<8x1xf32, #tpu.memory_space<vmem>>, vector<8x1xf32>
    %cst_52 = arith.constant dense<0xFF800000> : vector<8xf32>
    %115 = vector.multi_reduction <maximumf>, %113, %cst_52 [1] : vector<8x128xf32> to vector<8xf32>
    %116 = vector.shape_cast %115 : vector<8xf32> to vector<8x1xf32>
    %117 = arith.maximumf %114, %116 : vector<8x1xf32>
    %c0_53 = arith.constant 0 : index
    %c0_54 = arith.constant 0 : index
    %118 = vector.load %arg10[%c0_53, %c0_54] : memref<8x1xf32, #tpu.memory_space<vmem>>, vector<8x1xf32>
    %119 = arith.subf %114, %117 : vector<8x1xf32>
    %120 = math.exp %119 : vector<8x1xf32>
    %121 = arith.mulf %118, %120 : vector<8x1xf32>
    %122 = vector.broadcast %117 : vector<8x1xf32> to vector<8x128xf32>
    %123 = arith.subf %113, %122 : vector<8x128xf32>
    %124 = math.exp %123 : vector<8x128xf32>
    %cst_55 = arith.constant dense<0.000000e+00> : vector<8xf32>
    %125 = vector.multi_reduction <add>, %124, %cst_55 [1] : vector<8x128xf32> to vector<8xf32>
    %126 = vector.shape_cast %125 : vector<8xf32> to vector<8x1xf32>
    %127 = arith.addf %121, %126 : vector<8x1xf32>
    %c0_56 = arith.constant 0 : index
    %c0_57 = arith.constant 0 : index
    %128 = vector.load %arg10[%c0_56, %c0_57] : memref<8x1xf32, #tpu.memory_space<vmem>>, vector<8x1xf32>
    tpu.vector_store %arg10[%c0_56, %c0_57], %127 {strides = array<i32>} : memref<8x1xf32, #tpu.memory_space<vmem>>, vector<8x1xf32>,
    %c0_58 = arith.constant 0 : index
    %c0_59 = arith.constant 0 : index
    %129 = vector.load %arg9[%c0_58, %c0_59] : memref<8x1xf32, #tpu.memory_space<vmem>>, vector<8x1xf32>
    tpu.vector_store %arg9[%c0_58, %c0_59], %117 {strides = array<i32>} : memref<8x1xf32, #tpu.memory_space<vmem>>, vector<8x1xf32>,
    %c0_60 = arith.constant 0 : index
    %c0_61 = arith.constant 0 : index
    %130 = vector.load %arg11[%c0_60, %c0_61] : memref<8x1xf32, #tpu.memory_space<vmem>>, vector<8x1xf32>
    %131 = arith.mulf %104, %113 : vector<8x128xf32>
    %cst_62 = arith.constant dense<0.000000e+00> : vector<8xf32>
    %132 = vector.multi_reduction <add>, %131, %cst_62 [1] : vector<8x128xf32> to vector<8xf32>
    %133 = vector.shape_cast %132 : vector<8xf32> to vector<8x1xf32>
    %134 = arith.addf %130, %133 : vector<8x1xf32>
    %c0_63 = arith.constant 0 : index
    %c0_64 = arith.constant 0 : index
    %135 = vector.load %arg11[%c0_63, %c0_64] : memref<8x1xf32, #tpu.memory_space<vmem>>, vector<8x1xf32>
    tpu.vector_store %arg11[%c0_63, %c0_64], %134 {strides = array<i32>} : memref<8x1xf32, #tpu.memory_space<vmem>>, vector<8x1xf32>,
    %136 = tpu.iota {dimensions = array<i32: 1>} : vector<1x128xi32>
    %137 = vector.broadcast %97 : i32 to vector<1x128xi32>
    %138 = arith.addi %136, %137 : vector<1x128xi32>
    %c8_i32_65 = arith.constant 8 : i32
    %139 = vector.broadcast %c8_i32_65 : i32 to vector<1x128xi32>
    %140 = arith.cmpi slt, %138, %139 : vector<1x128xi32>
    %141 = arith.extui %140 : vector<1x128xi1> to vector<1x128xi32>
    %142 = arith.sitofp %141 : vector<1x128xi32> to vector<1x128xf32>
    %cst_66 = arith.constant 0.000000e+00 : f32
    %143 = vector.broadcast %cst_66 : f32 to vector<1x128xf32>
    %c0_67 = arith.constant 0 : index
    %c0_68 = arith.constant 0 : index
    %c0_69 = arith.constant 0 : index
    %c0_70 = arith.constant 0 : index
    %144 = vector.load %arg4[%c0_67, %c0_68, %c0_69, %c0_70] : memref<1x4x32x128xbf16, #tpu.memory_space<vmem>>, vector<1x1x32x128xbf16>
    %145 = vector.shape_cast %144 : vector<1x1x32x128xbf16> to vector<32x128xbf16>
    %146 = arith.extf %145 : vector<32x128xbf16> to vector<32x128xf32>
    %c0_71 = arith.constant 0 : index
    %c1_72 = arith.constant 1 : index
    %c0_73 = arith.constant 0 : index
    %c0_74 = arith.constant 0 : index
    %147 = vector.load %arg4[%c0_71, %c1_72, %c0_73, %c0_74] : memref<1x4x32x128xbf16, #tpu.memory_space<vmem>>, vector<1x1x32x128xbf16>
    %148 = vector.shape_cast %147 : vector<1x1x32x128xbf16> to vector<32x128xbf16>
    %149 = arith.extf %148 : vector<32x128xbf16> to vector<32x128xf32>
    %150 = arith.mulf %146, %149 : vector<32x128xf32>
    %cst_75 = arith.constant dense<0.000000e+00> : vector<128xf32>
    %151 = vector.multi_reduction <add>, %150, %cst_75 [0] : vector<32x128xf32> to vector<128xf32>
    %152 = vector.shape_cast %151 : vector<128xf32> to vector<1x128xf32>
    %cst_76 = arith.constant 2.000000e+00 : f32
    %153 = vector.broadcast %cst_76 : f32 to vector<1x128xf32>
    %154 = arith.mulf %153, %152 : vector<1x128xf32>
    %cst_77 = arith.constant 2.000010e+00 : f32
    %155 = vector.broadcast %cst_77 : f32 to vector<1x128xf32>
    %156 = arith.subf %155, %154 : vector<1x128xf32>
    %cst_78 = arith.constant 0.000000e+00 : f32
    %157 = vector.broadcast %cst_78 : f32 to vector<1x128xf32>
    %158 = arith.maximumf %156, %157 : vector<1x128xf32>
    %159 = math.sqrt %158 : vector<1x128xf32>
    %160 = arith.addf %143, %159 : vector<1x128xf32>
    %c0_79 = arith.constant 0 : index
    %c2_80 = arith.constant 2 : index
    %c0_81 = arith.constant 0 : index
    %c0_82 = arith.constant 0 : index
    %161 = vector.load %arg4[%c0_79, %c2_80, %c0_81, %c0_82] : memref<1x4x32x128xbf16, #tpu.memory_space<vmem>>, vector<1x1x32x128xbf16>
    %162 = vector.shape_cast %161 : vector<1x1x32x128xbf16> to vector<32x128xbf16>
    %163 = arith.extf %162 : vector<32x128xbf16> to vector<32x128xf32>
    %164 = arith.mulf %146, %163 : vector<32x128xf32>
    %cst_83 = arith.constant dense<0.000000e+00> : vector<128xf32>
    %165 = vector.multi_reduction <add>, %164, %cst_83 [0] : vector<32x128xf32> to vector<128xf32>
    %166 = vector.shape_cast %165 : vector<128xf32> to vector<1x128xf32>
    %cst_84 = arith.constant 2.000000e+00 : f32
    %167 = vector.broadcast %cst_84 : f32 to vector<1x128xf32>
    %168 = arith.mulf %167, %166 : vector<1x128xf32>
    %cst_85 = arith.constant 2.000010e+00 : f32
    %169 = vector.broadcast %cst_85 : f32 to vector<1x128xf32>
    %170 = arith.subf %169, %168 : vector<1x128xf32>
    %cst_86 = arith.constant 0.000000e+00 : f32
    %171 = vector.broadcast %cst_86 : f32 to vector<1x128xf32>
    %172 = arith.maximumf %170, %171 : vector<1x128xf32>
    %173 = math.sqrt %172 : vector<1x128xf32>
    %174 = arith.addf %160, %173 : vector<1x128xf32>
    %c0_87 = arith.constant 0 : index
    %c3_88 = arith.constant 3 : index
    %c0_89 = arith.constant 0 : index
    %c0_90 = arith.constant 0 : index
    %175 = vector.load %arg4[%c0_87, %c3_88, %c0_89, %c0_90] : memref<1x4x32x128xbf16, #tpu.memory_space<vmem>>, vector<1x1x32x128xbf16>
    %176 = vector.shape_cast %175 : vector<1x1x32x128xbf16> to vector<32x128xbf16>
    %177 = arith.extf %176 : vector<32x128xbf16> to vector<32x128xf32>
    %178 = arith.mulf %146, %177 : vector<32x128xf32>
    %cst_91 = arith.constant dense<0.000000e+00> : vector<128xf32>
    %179 = vector.multi_reduction <add>, %178, %cst_91 [0] : vector<32x128xf32> to vector<128xf32>
    %180 = vector.shape_cast %179 : vector<128xf32> to vector<1x128xf32>
    %cst_92 = arith.constant 2.000000e+00 : f32
    %181 = vector.broadcast %cst_92 : f32 to vector<1x128xf32>
    %182 = arith.mulf %181, %180 : vector<1x128xf32>
    %cst_93 = arith.constant 2.000010e+00 : f32
    %183 = vector.broadcast %cst_93 : f32 to vector<1x128xf32>
    %184 = arith.subf %183, %182 : vector<1x128xf32>
    %cst_94 = arith.constant 0.000000e+00 : f32
    %185 = vector.broadcast %cst_94 : f32 to vector<1x128xf32>
    %186 = arith.maximumf %184, %185 : vector<1x128xf32>
    %187 = math.sqrt %186 : vector<1x128xf32>
    %188 = arith.addf %174, %187 : vector<1x128xf32>
    %c0_95 = arith.constant 0 : index
    %c1_96 = arith.constant 1 : index
    %c0_97 = arith.constant 0 : index
    %c0_98 = arith.constant 0 : index
    %189 = vector.load %arg4[%c0_95, %c1_96, %c0_97, %c0_98] : memref<1x4x32x128xbf16, #tpu.memory_space<vmem>>, vector<1x1x32x128xbf16>
    %190 = vector.shape_cast %189 : vector<1x1x32x128xbf16> to vector<32x128xbf16>
    %191 = arith.extf %190 : vector<32x128xbf16> to vector<32x128xf32>
    %c0_99 = arith.constant 0 : index
    %c2_100 = arith.constant 2 : index
    %c0_101 = arith.constant 0 : index
    %c0_102 = arith.constant 0 : index
    %192 = vector.load %arg4[%c0_99, %c2_100, %c0_101, %c0_102] : memref<1x4x32x128xbf16, #tpu.memory_space<vmem>>, vector<1x1x32x128xbf16>
    %193 = vector.shape_cast %192 : vector<1x1x32x128xbf16> to vector<32x128xbf16>
    %194 = arith.extf %193 : vector<32x128xbf16> to vector<32x128xf32>
    %195 = arith.mulf %191, %194 : vector<32x128xf32>
    %cst_103 = arith.constant dense<0.000000e+00> : vector<128xf32>
    %196 = vector.multi_reduction <add>, %195, %cst_103 [0] : vector<32x128xf32> to vector<128xf32>
    %197 = vector.shape_cast %196 : vector<128xf32> to vector<1x128xf32>
    %cst_104 = arith.constant 2.000000e+00 : f32
    %198 = vector.broadcast %cst_104 : f32 to vector<1x128xf32>
    %199 = arith.mulf %198, %197 : vector<1x128xf32>
    %cst_105 = arith.constant 2.000010e+00 : f32
    %200 = vector.broadcast %cst_105 : f32 to vector<1x128xf32>
    %201 = arith.subf %200, %199 : vector<1x128xf32>
    %cst_106 = arith.constant 0.000000e+00 : f32
    %202 = vector.broadcast %cst_106 : f32 to vector<1x128xf32>
    %203 = arith.maximumf %201, %202 : vector<1x128xf32>
    %204 = math.sqrt %203 : vector<1x128xf32>
    %205 = arith.addf %188, %204 : vector<1x128xf32>
    %c0_107 = arith.constant 0 : index
    %c3_108 = arith.constant 3 : index
    %c0_109 = arith.constant 0 : index
    %c0_110 = arith.constant 0 : index
    %206 = vector.load %arg4[%c0_107, %c3_108, %c0_109, %c0_110] : memref<1x4x32x128xbf16, #tpu.memory_space<vmem>>, vector<1x1x32x128xbf16>
    %207 = vector.shape_cast %206 : vector<1x1x32x128xbf16> to vector<32x128xbf16>
    %208 = arith.extf %207 : vector<32x128xbf16> to vector<32x128xf32>
    %209 = arith.mulf %191, %208 : vector<32x128xf32>
    %cst_111 = arith.constant dense<0.000000e+00> : vector<128xf32>
    %210 = vector.multi_reduction <add>, %209, %cst_111 [0] : vector<32x128xf32> to vector<128xf32>
    %211 = vector.shape_cast %210 : vector<128xf32> to vector<1x128xf32>
    %cst_112 = arith.constant 2.000000e+00 : f32
    %212 = vector.broadcast %cst_112 : f32 to vector<1x128xf32>
    %213 = arith.mulf %212, %211 : vector<1x128xf32>
    %cst_113 = arith.constant 2.000010e+00 : f32
    %214 = vector.broadcast %cst_113 : f32 to vector<1x128xf32>
    %215 = arith.subf %214, %213 : vector<1x128xf32>
    %cst_114 = arith.constant 0.000000e+00 : f32
    %216 = vector.broadcast %cst_114 : f32 to vector<1x128xf32>
    %217 = arith.maximumf %215, %216 : vector<1x128xf32>
    %218 = math.sqrt %217 : vector<1x128xf32>
    %219 = arith.addf %205, %218 : vector<1x128xf32>
    %c0_115 = arith.constant 0 : index
    %c2_116 = arith.constant 2 : index
    %c0_117 = arith.constant 0 : index
    %c0_118 = arith.constant 0 : index
    %220 = vector.load %arg4[%c0_115, %c2_116, %c0_117, %c0_118] : memref<1x4x32x128xbf16, #tpu.memory_space<vmem>>, vector<1x1x32x128xbf16>
    %221 = vector.shape_cast %220 : vector<1x1x32x128xbf16> to vector<32x128xbf16>
    %222 = arith.extf %221 : vector<32x128xbf16> to vector<32x128xf32>
    %c0_119 = arith.constant 0 : index
    %c3_120 = arith.constant 3 : index
    %c0_121 = arith.constant 0 : index
    %c0_122 = arith.constant 0 : index
    %223 = vector.load %arg4[%c0_119, %c3_120, %c0_121, %c0_122] : memref<1x4x32x128xbf16, #tpu.memory_space<vmem>>, vector<1x1x32x128xbf16>
    %224 = vector.shape_cast %223 : vector<1x1x32x128xbf16> to vector<32x128xbf16>
    %225 = arith.extf %224 : vector<32x128xbf16> to vector<32x128xf32>
    %226 = arith.mulf %222, %225 : vector<32x128xf32>
    %cst_123 = arith.constant dense<0.000000e+00> : vector<128xf32>
    %227 = vector.multi_reduction <add>, %226, %cst_123 [0] : vector<32x128xf32> to vector<128xf32>
    %228 = vector.shape_cast %227 : vector<128xf32> to vector<1x128xf32>
    %cst_124 = arith.constant 2.000000e+00 : f32
    %229 = vector.broadcast %cst_124 : f32 to vector<1x128xf32>
    %230 = arith.mulf %229, %228 : vector<1x128xf32>
    %cst_125 = arith.constant 2.000010e+00 : f32
    %231 = vector.broadcast %cst_125 : f32 to vector<1x128xf32>
    %232 = arith.subf %231, %230 : vector<1x128xf32>
    %cst_126 = arith.constant 0.000000e+00 : f32
    %233 = vector.broadcast %cst_126 : f32 to vector<1x128xf32>
    %234 = arith.maximumf %232, %233 : vector<1x128xf32>
    %235 = math.sqrt %234 : vector<1x128xf32>
    %236 = arith.addf %219, %235 : vector<1x128xf32>
    %c0_127 = arith.constant 0 : index
    %c0_128 = arith.constant 0 : index
    %237 = vector.load %arg12[%c0_127, %c0_128] : memref<1x128xf32, #tpu.memory_space<vmem>>, vector<1x128xf32>
    %238 = arith.mulf %236, %142 : vector<1x128xf32>
    %239 = arith.addf %237, %238 : vector<1x128xf32>
    %c0_129 = arith.constant 0 : index
    %c0_130 = arith.constant 0 : index
    %240 = vector.load %arg12[%c0_129, %c0_130] : memref<1x128xf32, #tpu.memory_space<vmem>>, vector<1x128xf32>
    tpu.vector_store %arg12[%c0_129, %c0_130], %239 {strides = array<i32>} : memref<1x128xf32, #tpu.memory_space<vmem>>, vector<1x128xf32>,
    %c0_i32_131 = arith.constant 0 : i32
    %241 = arith.cmpi eq, %arg1, %c0_i32_131 : i32
    %242 = arith.extui %241 : i1 to i32
    %c0_i32_132 = arith.constant 0 : i32
    %243 = arith.cmpi ne, %242, %c0_i32_132 : i32
    scf.if %243 {
      %c0_133 = arith.constant 0 : index
      %c0_134 = arith.constant 0 : index
      %244 = vector.load %arg9[%c0_133, %c0_134] : memref<8x1xf32, #tpu.memory_space<vmem>>, vector<8x1xf32>
      %c0_135 = arith.constant 0 : index
      %c0_136 = arith.constant 0 : index
      %245 = vector.load %arg10[%c0_135, %c0_136] : memref<8x1xf32, #tpu.memory_space<vmem>>, vector<8x1xf32>
      %246 = math.log %245 : vector<8x1xf32>
      %247 = arith.addf %244, %246 : vector<8x1xf32>
      %c0_137 = arith.constant 0 : index
      %c0_138 = arith.constant 0 : index
      %248 = vector.load %arg11[%c0_137, %c0_138] : memref<8x1xf32, #tpu.memory_space<vmem>>, vector<8x1xf32>
      %249 = arith.subf %247, %248 : vector<8x1xf32>
      %250 = vector.shape_cast %249 : vector<8x1xf32> to vector<1x8x1xf32>
      %cst_139 = arith.constant dense<0.000000e+00> : vector<1xf32>
      %251 = vector.multi_reduction <add>, %250, %cst_139 [1, 2] : vector<1x8x1xf32> to vector<1xf32>
      %252 = vector.shape_cast %251 : vector<1xf32> to vector<1x1x1xf32>
      %253 = vector.extract %252[0, 0, 0] : f32 from vector<1x1x1xf32>
      %cst_140 = arith.constant 1.250000e-01 : f32
      %254 = arith.mulf %253, %cst_140 : f32
      %c0_141 = arith.constant 0 : index
      %c0_142 = arith.constant 0 : index
      %255 = vector.load %arg12[%c0_141, %c0_142] : memref<1x128xf32, #tpu.memory_space<vmem>>, vector<1x128xf32>
      %256 = vector.shape_cast %255 : vector<1x128xf32> to vector<1x1x128xf32>
      %cst_143 = arith.constant dense<0.000000e+00> : vector<1xf32>
      %257 = vector.multi_reduction <add>, %256, %cst_143 [1, 2] : vector<1x1x128xf32> to vector<1xf32>
      %258 = vector.shape_cast %257 : vector<1xf32> to vector<1x1x1xf32>
      %259 = vector.extract %258[0, 0, 0] : f32 from vector<1x1x1xf32>
      %cst_144 = arith.constant 0.010416667 : f32
      %260 = arith.mulf %259, %cst_144 : f32
      %261 = arith.mulf %5, %260 : f32
      %262 = arith.addf %254, %261 : f32
      %263 = vector.broadcast %262 : f32 to vector<1x1x128xf32>
      %c0_145 = arith.constant 0 : index
      %c0_146 = arith.constant 0 : index
      %c0_147 = arith.constant 0 : index
      %264 = vector.load %arg7[%c0_145, %c0_146, %c0_147] : memref<1x1x128xf32, #tpu.memory_space<vmem>>, vector<1x1x128xf32>
      tpu.vector_store %arg7[%c0_145, %c0_146, %c0_147], %263 {strides = array<i32>} : memref<1x1x128xf32, #tpu.memory_space<vmem>>, vector<1x1x128xf32>,
    } else {
    }
    return
  }
  func.func @transform_0(%arg0: i32, %arg1: i32) -> (i32, i32) {
    %c0_i32 = arith.constant 0 : i32
    %c0_i32_0 = arith.constant 0 : i32
    %c0_i32_1 = arith.constant 0 : i32
    return %c0_i32, %c0_i32_0 : i32, i32
  }
  func.func @transform_1(%arg0: i32, %arg1: i32) -> (i32, i32, i32) {
    %c0_i32 = arith.constant 0 : i32
    %c0_i32_0 = arith.constant 0 : i32
    %c0_i32_1 = arith.constant 0 : i32
    return %arg0, %c0_i32, %c0_i32_0 : i32, i32, i32
  }
  func.func @transform_2(%arg0: i32, %arg1: i32) -> (i32, i32, i32, i32) {
    %c0_i32 = arith.constant 0 : i32
    %c0_i32_0 = arith.constant 0 : i32
    %c0_i32_1 = arith.constant 0 : i32
    return %arg0, %c0_i32, %c0_i32_0, %arg1 : i32, i32, i32, i32
  }
  func.func @transform_3(%arg0: i32, %arg1: i32) -> (i32, i32, i32, i32) {
    %c0_i32 = arith.constant 0 : i32
    %c0_i32_0 = arith.constant 0 : i32
    %c0_i32_1 = arith.constant 0 : i32
    return %arg0, %c0_i32, %c0_i32_0, %arg1 : i32, i32, i32, i32
  }
  func.func @transform_4(%arg0: i32, %arg1: i32) -> (i32, i32, i32) {
    %c0_i32 = arith.constant 0 : i32
    %c0_i32_0 = arith.constant 0 : i32
    %c0_i32_1 = arith.constant 0 : i32
    return %arg0, %c0_i32, %c0_i32_0 : i32, i32, i32
  }
  func.func @transform_5(%arg0: i32, %arg1: i32) -> (i32, i32, i32) {
    %c0_i32 = arith.constant 0 : i32
    %c0_i32_0 = arith.constant 0 : i32
    %c0_i32_1 = arith.constant 0 : i32
    return %arg0, %c0_i32, %c0_i32_0 : i32, i32, i32
  }
  func.func @transform_6(%arg0: i32, %arg1: i32) -> (i32, i32, i32) {
    %c0_i32 = arith.constant 0 : i32
    %c0_i32_0 = arith.constant 0 : i32
    return %arg0, %c0_i32, %arg1 : i32, i32, i32
  }
}

</mosaic_0001>

<bundles_post_ra>
// kernel: tpu_custom_call.1
= control target key start
LH: loop header
LB: loop body
LE: loop exit
PB: predicated region body
PF: predicated region fallthrough
CT: control target
= control target key end

     0   :  { %s2012_s0 = inlined_call_operand.vmem [shape: f32[2,4], index: 0, kind: input, shape index: {}]   ;;  %s2013_s1 = inlined_call_operand.vmem [shape: f32[2,8,32], index: 1, kind: input, shape index: {}]   ;;  %s2014_s2 = inlined_call_operand.hbm [shape: bf16[2,4,32,128], index: 2, kind: input, shape index: {}]   ;;  %s2015_s3 = inlined_call_operand.hbm [shape: f32[2,4,1,128], index: 3, kind: input, shape index: {}]   ;;  %s2016_s4 = inlined_call_operand.vmem [shape: s32[2,8,1], index: 4, kind: input, shape index: {}]   ;;  %s2017_s5 = inlined_call_operand.hbm [shape: f32[2,1,128], index: 5, kind: output, shape index: {0}]   ;;  %s2018_s6 = inlined_call_operand.hbm [shape: f32[2,8,128], index: 6, kind: output, shape index: {1}]  }
   0x1   :  { %2025 = sst [smem:[#allocation26_spill]] %s2012_s0 }
   0x2   :  { %2026 = sst [smem:[#allocation27_spill]] %s2014_s2 }
   0x3   :  { %12 = vsyncpa [#allocation9], 0 }
   0x4   :  { %13 = vsyncpa [#allocation7], 0 }
   0x5   :  { %15 = vsyncpa [#allocation7 + $0x1], 0 }
   0x6   :  { %16 = vsyncpa [#allocation12], 0 }
   0x7   :  { %18 = vsyncpa [#allocation12 + $0x1], 0 }
   0x8   :  { %19 = vsyncpa [#allocation8], 0 }
   0x9   :  { %21 = vsyncpa [#allocation8 + $0x1], 0 }
   0xa   :  { %22 = vsyncpa [#allocation15], 0 }
   0xb   :  { %24 = vsyncpa [#allocation15 + $0x1], 0  ;;  %s1710_s21 = smov 0   ;;  %s1712_s22 = smov 0  }
   0xc   :  { %s1714_s23 = smov 0   ;;  %s1716_s24 = smov 0  }
   0xd   :  { %s1718_s25 = smov 0   ;;  %s1720_s26 = smov 0  }
   0xe LB: > { %2027 = sst [smem:[#allocation21_spill]] %s1640_s21  ;;  %s1182_s27 = sadd.s32 4294967295, %s1660_s26   ;;  %s1660_s26 = sphi %s1720_s26, %s30_s26   ;;  %s1656_s25 = sphi %s1718_s25, %s2056_s25   ;;  %s1652_s24 = sphi %s1716_s24, %s2055_s24   ;;  %s1648_s23 = sphi %s1714_s23, %s2054_s23   ;;  %s1644_s22 = sphi %s1712_s22, %s2053_s22   ;;  %s1640_s21 = sphi %s1710_s21, %s2052_s21  }
   0xf   : > { %2028 = sst [smem:[#allocation22_spill]] %s1660_s26  ;;  %s1183_s28 = sadd.s32 4294967294, %s1660_s26  }
  0x10   : > { %p105_p0 = scmp.ne.s32.totalorder %s1648_s23, %s1644_s22  ;;  %p106_p1 = scmp.eq.s32.totalorder %s1660_s26, 0 }
  0x11   : > { %p111_p2 = scmp.ne.s32.totalorder %s1644_s22, %s1640_s21  ;;  %p1748_p3 = scmp.eq.s32.totalorder %s1182_s27, 0 }
  0x12   : > { %p189_p4 = scmp.eq.s32.totalorder %s1182_s27, 1  ;;  %p1752_p5 = por %p106_p1, %p105_p0 }
  0x13   : > { %p195_p6 = scmp.eq.s32.totalorder %s1183_s28, 1  ;;  %p1758_p7 = por %p1748_p3, %p111_p2 }
  0x14   : > { %p1762_p8 = por %p189_p4, %p105_p0  ;;  %p1184_p10 = scmp.ge.s32.totalorder %s1660_s26, 1 }
  0x15   : > { %p1766_p9 = por %p195_p6, %p111_p2  ;;  %p230_p11 = scmp.lt.s32.totalorder %s1660_s26, 3 }
  0x16   : > { %s2032_s9 = scalar_select %p1762_p8, 1, 0 }
  0x17   : > { %s2033_s10 = scalar_select %p1766_p9, 1, 0 }
  0x18   : > { %s2035_s0 = sld [smem:[#allocation26_spill]]  ;;  %p1775_p12 = pnand %p1184_p10, %p230_p11 }
  0x19   : > { %2034 = sst [smem:[#allocation23_spill]] %s2033_s10  ;;  %p1371_p0 = scmp.lt.s32.totalorder %s1660_s26, 2 }
  0x1a   : > { %p1352_p1 = pneg %p1775_p12  ;;  %s42_s17 = sadd.s32 1, %s1656_s25 }
  0x1b   : > { %p1785_p2 = pnand %p1371_p0, %p1752_p5  ;;  %p1796_p6 = scmp.ge.s32.totalorder %s42_s17, 2 }
  0x1c   : > { %p1791_p4 = pnand %p1352_p1, %p1748_p3  ;;  %s1801_s19 = sand.u32 1, %s1648_s23  }
  0x1e   : > { %s243_s13 = sshll.u32 %s2035_s0, 4  ;;  %p1473_p5 = pneg %p1791_p4  ;;  %s244_s13 = int_to_ptr.vmem [resolvable:$true] %s243_s13 }
  0x1f   : > { %s1471_s20 = scalar_lea.vmem %s244_s13, 32  ;;  %p1479_p13 = scmp.lt.s32.totalorder %s244_s13, %s244_s13 }
  0x20   : > { %p1472_p10 = scmp.ne.s32.totalorder %s244_s13, %s1471_s20  ;;  %p1480_p9 = scmp.lt.s32.totalorder %s1471_s20, %s1471_s20 }
  0x22   : > { %p1474_p11 = pnand %p1473_p5, %p1472_p10  ;;  %p1481_p1 = por %p1480_p9, %p1479_p13 }
  0x24   : > { %p1475_p0 = pneg %p1474_p11 }
  0x26   : > { %p1482_p8 = pnand %p1481_p1, %p1475_p0 }
  0x28   : > { %1485 = shalt.err (!%p1482_p8)
}
  0x29   : > { %s1662_s27 = smov [#allocation6]   ;;  %s2058_s17 = smov (%p1796_p6, %s42_s17), 0 }
  0x2a   : > { %1355 = dma.vmem_to_smem (!%p1791_p4), %s244_s13, 32, %s1662_s27, [#allocation9]  }
  0x2b   : > { %2040 = sst [smem:[#allocation24_spill]] %s2058_s17  ;;  %s1187_s28 = sshll.u32 %s1801_s19, 6 }
  0x2c   : > { %s93_s7 = ssub.s32 %s1656_s25, %s2058_s17  ;;  %s1251_s11 = sshll.u32 %s1656_s25, 10 }
  0x2d   : > { %p96_p8 = scmp.eq.s32.totalorder %s93_s7, 0  ;;  %s2041_s2 = sld [smem:[#allocation27_spill]] }
  0x2e   : > { %s265_s29 = scalar_lea.vmem [#allocation10], %s1187_s28  ;;  %s2042_s26 = sadd.s32 1, %s1648_s23 }
  0x2f   : > { %s273_s0 = sshll.u32 %s265_s29, 4  ;;  %s262_s21 = scalar_lea.sflag [#allocation7], %s1801_s19  ;;  %s274_s0 = int_to_ptr.vmem [resolvable:$true] %s273_s0 }
  0x30   : > { %s1821_s10 = scalar_select %p96_p8, %s1648_s23, %s2042_s26  }
  0x31   : > { %p1488_p9 = pneg %p1785_p2  ;;  %s1499_s13 = scalar_lea.vmem %s274_s0, 1024 }
  0x32   : > { %2043 = sst [smem:[#allocation25_spill]] %s1821_s10  ;;  %p1500_p13 = scmp.ne.s32.totalorder %s274_s0, %s1499_s13 }
  0x33   : > { %s272_s20 = scalar_lea.hbm %s2041_s2, %s1251_s11  ;;  %s1663_s18 = smov [#allocation10]  }
  0x34   : > { %p1502_p4 = pnand %p1500_p13, %p1488_p9  ;;  %s1504_s27 = sshll.u32 %s1663_s18, 4  ;;  %s1505_s27 = int_to_ptr.vmem [resolvable:$false] %s1504_s27 }
  0x35   : > { %s1506_s7 = scalar_lea.vmem %s1505_s27, 2048  ;;  %p1507_p10 = scmp.lt.s32.totalorder %s274_s0, %s1505_s27 }
  0x36   : > { %p1503_p6 = pneg %p1502_p4  ;;  %p1508_p5 = scmp.lt.s32.totalorder %s1506_s7, %s1499_s13 }
  0x38   : > { %p1509_p11 = por %p1508_p5, %p1507_p10 }
  0x3a   : > { %p1510_p0 = pnand %p1509_p11, %p1503_p6 }
  0x3c   : > { %1513 = shalt.err (!%p1510_p0)
}
  0x3d   : > { %s1664_s26 = smov 64   ;;  %s1665_s29 = smov 4  }
  0x3e   : > { %1359 = dma.hbm_to_vmem [thread:$0]  (!%p1785_p2), %s272_s20, 1024, %s274_s0, %s262_s21, %s1664_s26, %s1664_s26, %s1665_s29  }
  0x3f   : > { %s1190_s28 = sshll.u32 %s1801_s19, 2  ;;  %s1252_s11 = sshll.u32 %s1656_s25, 6 }
  0x40   : > { %s294_s18 = scalar_lea.hbm %s2015_s3, %s1252_s11  ;;  %s287_s27 = scalar_lea.vmem [#allocation11], %s1190_s28 }
  0x41   : > { %s295_s13 = sshll.u32 %s287_s27, 4  ;;  %s284_s7 = scalar_lea.sflag [#allocation12], %s1801_s19  ;;  %s296_s13 = int_to_ptr.vmem [resolvable:$true] %s295_s13 }
  0x42   : > { %s1527_s2 = scalar_lea.vmem %s296_s13, 64  ;;  %s1666_s17 = smov [#allocation11]  }
  0x43   : > { %p1528_p1 = scmp.ne.s32.totalorder %s296_s13, %s1527_s2  ;;  %s1532_s10 = sshll.u32 %s1666_s17, 4  ;;  %s1533_s10 = int_to_ptr.vmem [resolvable:$false] %s1532_s10 }
  0x44   : > { %s1534_s0 = scalar_lea.vmem %s1533_s10, 128  ;;  %p1535_p4 = scmp.lt.s32.totalorder %s296_s13, %s1533_s10 }
  0x45   : > { %p1530_p8 = pnand %p1528_p1, %p1488_p9  ;;  %p1536_p6 = scmp.lt.s32.totalorder %s1534_s0, %s1527_s2 }
  0x47   : > { %p1531_p13 = pneg %p1530_p8  ;;  %p1537_p10 = por %p1536_p6, %p1535_p4 }
  0x49   : > { %p1538_p5 = pnand %p1537_p10, %p1531_p13 }
  0x4b   : > { %1541 = shalt.err (!%p1538_p5)
}
  0x4c   : > { %s1667_s21 = smov 16   ;;  %s1668_s20 = smov 1  }
  0x4d   : > { %1362 = dma.hbm_to_vmem [thread:$0]  (!%p1785_p2), %s294_s18, 64, %s296_s13, %s284_s7, %s1667_s21, %s1667_s21, %s1668_s20  }
  0x4e   : > { %314 = sbr.rel (%p1775_p12) target bundleno = 1191 (0x4a7), region = 40 }
  0x53   : > { %1619 = dma.done.wait (%p1748_p3), [#allocation9], 32  }
  0x54   : > { %1621 = vsyncadd (%p1748_p3), [#allocation9], 4294967264  ;;  %s1849_s2 = sand.u32 1, %s1644_s22  }
  0x55   : > { %s1195_s10 = sshll.u32 %s1849_s2, 6  ;;  %s321_s17 = scalar_lea.sflag [#allocation7], %s1849_s2 }
  0x56   : > { %s1853_s19 = scalar_lea.vmem [#allocation10], %s1195_s10 }
  0x57   : > { %1623 = dma.done.wait (%p1758_p7), %s321_s17, 1024  }
  0x58   : > { %1625 = vsyncadd (%p1758_p7), %s321_s17, 4294966272  ;;  %s1196_s30 = sshll.u32 %s1849_s2, 2  ;;  %s330_s14 = scalar_lea.sflag [#allocation12], %s1849_s2 }
  0x59   : > { %s1861_s15 = scalar_lea.vmem [#allocation11], %s1196_s30 }
  0x5a   : > { %1627 = dma.done.wait (%p1758_p7), %s330_s14, 64  }
  0x5b   : > { %1629 = vsyncadd (%p1758_p7), %s330_s14, 4294967232 }
  0x5c   : > { %338 = sfence }
  0x5d   : > { %p380_p3 = scmp.lt.s32.totalorder %s1652_s24, 1  ;;  %vm409_vm0 = vcmask 261120   ;;  %v1433_v3 = vld [vmem:[%s1853_s19 + $0x8] sm:$0xff]   ;;  %v1434_v4 = vld [vmem:[%s1853_s19 + $0x18] sm:$0xff]   ;;  %v1669_v5 = vmov 0.0   ;;  %v1435_v6 = vld [vmem:[%s1853_s19] sm:$0xff]  }
  0x5e   : > { %1304 = vmatprep.subr.bf16.mxu0 %v1669_v5  ;;  %405 = vst [vmem:[#allocation5] sm:$0x1] %v1669_v5  ;;  %1312 = vmatprep.subr.bf16.mxu1 %v1669_v5  ;;  %v1436_v7 = vld [vmem:[%s1853_s19 + $0x10] sm:$0xff]   ;;  %vm1670_vm1 = vmmov 0   ;;  %v1671_v8 = vmov 0   ;;  %v1437_v14 = vld [vmem:[%s1853_s19 + $0x28] sm:$0xff]  }
  0x5f   : > { %s381_s26 = scalar_select %p380_p3, %s1652_s24, 1  ;;  %1305 = vmatpush3.bf16.msra.mxu0 %v1433_v3  ;;  %1313 = vmatpush3.bf16.msra.mxu1 %v1434_v4  ;;  %v1438_v15 = vld [vmem:[%s1853_s19 + $0x38] sm:$0xff]   ;;  %v1439_v17 = vld [vmem:[%s1853_s19 + $0x20] sm:$0xff]   ;;  %v1440_v18 = vld [vmem:[%s1853_s19 + $0x30] sm:$0xff]   ;;  %vm401_vm2 = vcmask 7168  }
  0x60   : > { %1306 = vmatprep.subr.bf16.mxu0 %v1669_v5  ;;  %1314 = vmatprep.subr.bf16.mxu1 %v1669_v5  ;;  %v1254_v19 = vld [vmem:[%s1853_s19] sm:$0xff]   ;;  %v1285_v20 = vld [vmem:[%s1853_s19 + $0x8] sm:$0xff]   ;;  %v1286_v21 = vld [vmem:[%s1853_s19 + $0x10] sm:$0xff]   ;;  %403 = vst.msk [vmem:[#allocation3] sm:$0xff] %vm401_vm2, %v1669_v5  ;;  %s1919_s27 = sshll.u32 %s1652_s24, 7  ;;  %s1197_s10 = sshll.u32 %s1849_s2, 3 }
  0x61   : > { %s1198_s29 = sshll.u32 %s381_s26, 3  ;;  %1308 = vmatprep.mubr.msk.bf16.mxu0 %vm1670_vm1, %v1669_v5  ;;  %1316 = vmatprep.mubr.msk.bf16.mxu1 %vm1670_vm1, %v1669_v5  ;;  %v1255_v22 = vunpack.c.l.bf16 %v1254_v19  ;;  %v1256_v23 = vunpack.c.h.bf16 %v1254_v19  ;;  %v1259_v24 = vunpack.c.l.bf16 %v1285_v20  ;;  %v1260_v25 = vunpack.c.h.bf16 %v1285_v20  ;;  %v1287_v26 = vld [vmem:[%s1853_s19 + $0x18] sm:$0xff]   ;;  %v1288_v27 = vld [vmem:[%s1853_s19 + $0x20] sm:$0xff]   ;;  %v1289_v28 = vld [vmem:[%s1853_s19 + $0x28] sm:$0xff]   ;;  %404 = vst.msk [vmem:[#allocation4] sm:$0xff] %vm401_vm2, %v1669_v5  ;;  %s391_s13 = sadd.s32 1, %s1919_s27 }
  0x62   : > { %s383_s12 = scalar_lea.vmem %s2013_s1, %s1198_s29  ;;  %s387_s18 = scalar_lea.vmem %s2016_s4, %s1198_s29  ;;  %1431 = vset.pattern.permute.xlu0 %v1671_v8  ;;  %1432 = vset.pattern.permute.xlu1 %v1671_v8  ;;  %v1263_v29 = vunpack.c.l.bf16 %v1286_v21  ;;  %v1264_v30 = vunpack.c.h.bf16 %v1286_v21  ;;  %v1267_v31 = vunpack.c.l.bf16 %v1287_v26  ;;  %v1268_v32 = vunpack.c.h.bf16 %v1287_v26  ;;  %v1290_v37 = vld [vmem:[%s1853_s19 + $0x30] sm:$0xff]   ;;  %v1291_v38 = vld [vmem:[%s1853_s19 + $0x38] sm:$0xff]  }
  0x63   : > { %v406_v0 = vld [vmem:[%s383_s12] sm:$0xff]  ;;  %1307 = vmatpush3.bf16.msra.mxu0 %v1435_v6  ;;  %1315 = vmatpush3.bf16.msra.mxu1 %v1436_v7  ;;  %v1271_v33 = vunpack.c.l.bf16 %v1288_v27  ;;  %v1272_v34 = vunpack.c.h.bf16 %v1288_v27  ;;  %v1275_v35 = vunpack.c.l.bf16 %v1289_v28  ;;  %v1276_v36 = vunpack.c.h.bf16 %v1289_v28  ;;  %s392_s7 = sld [smem:[#allocation6 + %s391_s13]]  ;;  %s395_s0 = sadd.s32 3, %s1919_s27 }
  0x64   : > { %v408_v1 = vmul.f32 %v406_v0, %v406_v0  ;;  %1320 = vmatprep.subr.bf16.mxu0 %v1669_v5  ;;  %1328 = vmatprep.subr.bf16.mxu1 %v1669_v5  ;;  %v407_v9 = vld [vmem:[%s387_s18] sm:$0xff]  ;;  %v778_v39 = vmul.f32 %v1263_v29, %v1255_v22  ;;  %v779_v40 = vmul.f32 %v1264_v30, %v1256_v23  ;;  %v1279_v48 = vunpack.c.l.bf16 %v1290_v37  ;;  %s396_s21 = sld [smem:[#allocation6 + %s395_s0]]  ;;  %s1937_s17 = scalar_lea.vmem [#allocation14], %s1197_s10 }
  0x65   : > { %v780_v41 = vmul.f32 %v1267_v31, %v1259_v24  ;;  %v781_v42 = vmul.f32 %v1268_v32, %v1260_v25  ;;  %v810_v43 = vmul.f32 %v1271_v33, %v1255_v22  ;;  %v811_v44 = vmul.f32 %v1272_v34, %v1256_v23  ;;  %s390_s20 = sld [smem:[#allocation6 + %s1919_s27]]  ;;  %s1010_s14 = scalar_lea.hbm %s2018_s6, %s1919_s27 }
  0x66   : > { %v410_v2 = vsel %vm409_vm0, %v408_v1, 0.0  ;;  %v812_v45 = vmul.f32 %v1275_v35, %v1259_v24  ;;  %v813_v46 = vmul.f32 %v1276_v36, %v1260_v25  ;;  %v782_v47 = vadd.f32 %v779_v40, %v778_v39  ;;  %s985_s26 = scalar_lea.sflag [#allocation15], %s1849_s2  ;;  %p2044_p12 = scmp.ne.s32.totalorder %s2032_s9, 0 }
  0x67   : > { %411 = vadd.xlane.f32.xlu0 %v410_v2  ;;  %v1280_v49 = vunpack.c.h.bf16 %v1290_v37  ;;  %v1283_v50 = vunpack.c.l.bf16 %v1291_v38  ;;  %v814_v51 = vadd.f32 %v811_v44, %v810_v43  ;;  %v1284_v52 = vunpack.c.h.bf16 %v1291_v38  ;;  %s1673_s28 = smov [#allocation14]  }
  0x68   : > { %v866_v53 = vmul.f32 %v1271_v33, %v1263_v29  ;;  %v867_v54 = vmul.f32 %v1272_v34, %v1264_v30  ;;  %v783_v55 = vadd.f32 %v782_v47, %v780_v41  ;;  %v842_v56 = vmul.f32 %v1279_v48, %v1255_v22  ;;  %s1546_s11 = sshll.u32 %s1673_s28, 4  ;;  %s1547_s11 = int_to_ptr.vmem [resolvable:$false] %s1546_s11 }
  0x69   : > { %v843_v57 = vmul.f32 %v1280_v49, %v1256_v23  ;;  %v844_v58 = vmul.f32 %v1283_v50, %v1259_v24  ;;  %v815_v59 = vadd.f32 %v814_v51, %v812_v45  ;;  %v845_v60 = vmul.f32 %v1284_v52, %v1260_v25  ;;  %s1548_s12 = scalar_lea.vmem %s1547_s11, 256 }
  0x6a   : > { %v868_v61 = vmul.f32 %v1275_v35, %v1267_v31  ;;  %v869_v62 = vmul.f32 %v1276_v36, %v1268_v32  ;;  %v784_v63 = vadd.f32 %v783_v55, %v781_v42  ;;  %v870_v1 = vadd.f32 %v867_v54, %v866_v53 }
  0x6b   : > { %v890_v2 = vmul.f32 %v1279_v48, %v1263_v29  ;;  %v816_v3 = vadd.f32 %v815_v59, %v813_v46  ;;  %v891_v4 = vmul.f32 %v1280_v49, %v1264_v30  ;;  %v892_v6 = vmul.f32 %v1283_v50, %v1267_v31 }
  0x6c   : > { %v893_v7 = vmul.f32 %v1284_v52, %v1268_v32  ;;  %v785_v8 = vrot.slane %v784_v63, 4  ;;  %v917_v19 = vmul.f32 %v1284_v52, %v1276_v36  ;;  %v1672_v29 = vmov -1e+30  }
  0x6d   : > { %402 = vst.msk [vmem:[#allocation2] sm:$0xff] %vm401_vm2, %v1672_v29 }
  0x7d   : > { %719 = vperm.xlu0 %1431, %v407_v9  }
  0xf0   : > { %v412_v10 = vpop.xlane.xlu0 %411 }
  0xf1   : > { %v413_v11 = vmax.f32 %v412_v10, 1e-24  ;;  %v871_v10 = vadd.f32 %v870_v1, %v868_v61 }
  0xf3   : > { %1441 = vrsqrt.f32 %v413_v11  ;;  %v914_v11 = vmul.f32 %v1279_v48, %v1271_v33 }
 0x100   : > { %v1442_v12 = vpop.eup %1441 }
 0x101   : > { %v415_v13 = vmul.f32 %v1442_v12, %v406_v0  ;;  %v846_v0 = vadd.f32 %v843_v57, %v842_v56  ;;  %v817_v12 = vrot.slane %v816_v3, 4 }
 0x103   : > { %v416_v16 = vpack.c.bf16 %v415_v13, %v415_v13  ;;  %v847_v9 = vadd.f32 %v846_v0, %v844_v58  ;;  %v894_v13 = vadd.f32 %v891_v4, %v890_v2  ;;  %v818_v20 = vadd.f32 %v817_v12, %v816_v3 }
 0x105   : > { %1309 = vmatmul.mubr.msk.bf16.vlgmr.msra.gmra.mxu0 %vm409_vm0, %v416_v16  ;;  %1317 = vmatmul.mubr.msk.bf16.vlgmr.msra.gmra.mxu1 %vm409_vm0, %v416_v16  ;;  %v895_v21 = vadd.f32 %v894_v13, %v892_v6  ;;  %v819_v26 = vrot.slane %v818_v20, 2 }
 0x106   : > { %1321 = vmatpush3.bf16.msra.mxu0 %v1437_v14  ;;  %1329 = vmatpush3.bf16.msra.mxu1 %v1438_v15  ;;  %v915_v14 = vmul.f32 %v1280_v49, %v1272_v34  ;;  %v916_v15 = vmul.f32 %v1283_v50, %v1275_v35 }
 0x107   : > { %1322 = vmatprep.subr.bf16.mxu0 %v1669_v5  ;;  %1330 = vmatprep.subr.bf16.mxu1 %v1669_v5  ;;  %v896_v27 = vadd.f32 %v895_v21, %v893_v7  ;;  %v820_v33 = vadd.f32 %v819_v26, %v818_v20 }
 0x108   : > { %1324 = vmatprep.mubr.msk.bf16.mxu0 %vm1670_vm1, %v1669_v5  ;;  %1332 = vmatprep.mubr.msk.bf16.mxu1 %vm1670_vm1, %v1669_v5  ;;  %v918_v22 = vadd.f32 %v915_v14, %v914_v11  ;;  %vm964_vm1 = vcmask 1040384  }
 0x109   : > { %v897_v34 = vrot.slane %v896_v27, 4  ;;  %v821_v39 = vrot.slane %v820_v33, 1 }
 0x10a   : > { %1323 = vmatpush3.bf16.msra.mxu0 %v1439_v17  ;;  %1331 = vmatpush3.bf16.msra.mxu1 %v1440_v18  ;;  %v848_v17 = vadd.f32 %v847_v9, %v845_v60  ;;  %v872_v18 = vadd.f32 %v871_v10, %v869_v62  ;;  %v919_v28 = vadd.f32 %v918_v22, %v916_v15 }
 0x10b   : > { %v898_v40 = vadd.f32 %v897_v34, %v896_v27  ;;  %v822_v45 = vadd.f32 %v821_v39, %v820_v33 }
 0x10c   : > { %v849_v24 = vrot.slane %v848_v17, 4  ;;  %v873_v25 = vrot.slane %v872_v18, 4  ;;  %v920_v35 = vadd.f32 %v919_v28, %v917_v19 }
 0x10d   : > { %1325 = vmatmul.mubr.msk.bf16.vlgmr.msra.gmra.mxu0 %vm409_vm0, %v416_v16  ;;  %1333 = vmatmul.mubr.msk.bf16.vlgmr.msra.gmra.mxu1 %vm409_vm0, %v416_v16  ;;  %v786_v16 = vadd.f32 %v785_v8, %v784_v63  ;;  %v899_v46 = vrot.slane %v898_v40, 2  ;;  %v823_v51 = vmul.f32 2.0, %v822_v45 }
 0x10e   : > { %v850_v31 = vadd.f32 %v849_v24, %v848_v17  ;;  %v874_v32 = vadd.f32 %v873_v25, %v872_v18  ;;  %v921_v41 = vrot.slane %v920_v35, 4 }
 0x10f   : > { %v787_v23 = vrot.slane %v786_v16, 2  ;;  %v900_v52 = vadd.f32 %v899_v46, %v898_v40  ;;  %v824_v57 = vsub.f32 2.00001, %v823_v51 }
 0x110   : > { %v851_v37 = vrot.slane %v850_v31, 2  ;;  %v875_v38 = vrot.slane %v874_v32, 2  ;;  %v922_v47 = vadd.f32 %v921_v41, %v920_v35 }
 0x111   : > { %v788_v30 = vadd.f32 %v787_v23, %v786_v16  ;;  %v901_v58 = vrot.slane %v900_v52, 1  ;;  %v825_v63 = vmax.f32 %v824_v57, 0.0  ;;  %v1210_v57 = vld [vmem:[%s1861_s15 + $0x1] ss:$0 sm:$0xff] }
 0x112   : > { %v852_v43 = vadd.f32 %v851_v37, %v850_v31  ;;  %v876_v44 = vadd.f32 %v875_v38, %v874_v32  ;;  %v923_v53 = vrot.slane %v922_v47, 2  ;;  %v714_v31 = vlaneseq }
 0x113   : > { %v789_v36 = vrot.slane %v788_v30, 1  ;;  %v902_v0 = vadd.f32 %v901_v58, %v900_v52  ;;  %vm828_vm5 = vcmp.eq.f32.partialorder %v825_v63, inf  ;;  %v831_v18 = vand.u32 2147483648, %v825_v63  ;;  %v938_v52 = vld [vmem:[#allocation5] sm:$0x1] }
 0x114   : > { %v853_v49 = vrot.slane %v852_v43, 1  ;;  %v877_v50 = vrot.slane %v876_v44, 1  ;;  %v924_v59 = vadd.f32 %v923_v53, %v922_v47  ;;  %vm830_vm6 = vcmp.eq.f32.partialorder %v825_v63, 0.0 }
 0x115   : > { %v790_v42 = vadd.f32 %v789_v36, %v788_v30  ;;  %v903_v4 = vmul.f32 2.0, %v902_v0 }
 0x116   : > { %v854_v55 = vadd.f32 %v853_v49, %v852_v43  ;;  %v878_v56 = vadd.f32 %v877_v50, %v876_v44  ;;  %v925_v1 = vrot.slane %v924_v59, 1  ;;  %v1921_v44 = vand.u32 127, %v714_v31 }
 0x117   : > { %v791_v48 = vmul.f32 2.0, %v790_v42  ;;  %v904_v9 = vsub.f32 2.00001, %v903_v4  ;;  %v1219_v4 = vld [vmem:[%s1861_s15 + $0x2] ss:$0 sm:$0xff] }
 0x118   : > { %v855_v61 = vmul.f32 2.0, %v854_v55  ;;  %v879_v62 = vmul.f32 2.0, %v878_v56  ;;  %v926_v6 = vadd.f32 %v925_v1, %v924_v59  ;;  %vm729_vm15 = vcmp.lt.s32.totalorder %v1921_v44, 8  ;;  %v1201_v55 = vld [vmem:[%s1861_s15] ss:$0 sm:$0xff] }
 0x119   : > { %v792_v54 = vsub.f32 2.00001, %v791_v48  ;;  %v905_v11 = vmax.f32 %v904_v9, 0.0  ;;  %v1233_v49 = vsel %vm729_vm15, 1.0, %v1669_v5 }
 0x11a   : > { %v856_v2 = vsub.f32 2.00001, %v855_v61  ;;  %v880_v3 = vsub.f32 2.00001, %v879_v62  ;;  %v927_v10 = vmul.f32 2.0, %v926_v6 }
 0x11b   : > { %v793_v60 = vmax.f32 %v792_v54, 0.0  ;;  %vm908_vm11 = vcmp.eq.f32.partialorder %v905_v11, inf  ;;  %v911_v36 = vand.u32 2147483648, %v905_v11  ;;  %vm910_vm12 = vcmp.eq.f32.partialorder %v905_v11, 0.0  ;;  %v1228_v6 = vld [vmem:[%s1861_s15 + $0x3] ss:$0 sm:$0xff] }
 0x11c   : > { %v857_v7 = vmax.f32 %v856_v2, 0.0  ;;  %v881_v8 = vmax.f32 %v880_v3, 0.0  ;;  %v928_v12 = vsub.f32 2.00001, %v927_v10  ;;  %s1012_s15 = sshll.u32 %s1937_s17, 4  ;;  %s1013_s15 = int_to_ptr.vmem [resolvable:$true] %s1012_s15 }
 0x11d   : > { %1443 = vrsqrt.f32 %v793_v60  ;;  %vm796_vm3 = vcmp.eq.f32.partialorder %v793_v60, inf  ;;  %v799_v15 = vand.u32 2147483648, %v793_v60  ;;  %vm798_vm4 = vcmp.eq.f32.partialorder %v793_v60, 0.0  ;;  %s1542_s29 = scalar_lea.vmem %s1013_s15, 128  ;;  %p1549_p11 = scmp.lt.s32.totalorder %s1013_s15, %s1547_s11 }
 0x11e   : > { %1445 = vrsqrt.f32 %v825_v63  ;;  %v929_v13 = vmax.f32 %v928_v12, 0.0  ;;  %vm860_vm7 = vcmp.eq.f32.partialorder %v857_v7, inf  ;;  %vm862_vm8 = vcmp.eq.f32.partialorder %v857_v7, 0.0  ;;  %p1543_p7 = scmp.ne.s32.totalorder %s1013_s15, %s1542_s29  ;;  %p1550_p0 = scmp.lt.s32.totalorder %s1548_s12, %s1542_s29 }
 0x11f   : > { %1447 = vrsqrt.f32 %v857_v7  ;;  %v863_v25 = vand.u32 2147483648, %v857_v7  ;;  %vm884_vm9 = vcmp.eq.f32.partialorder %v881_v8, inf  ;;  %v887_v29 = vand.u32 2147483648, %v881_v8 }
 0x120   : > { %1449 = vrsqrt.f32 %v881_v8  ;;  %vm886_vm10 = vcmp.eq.f32.partialorder %v881_v8, 0.0  ;;  %vm932_vm13 = vcmp.eq.f32.partialorder %v929_v13, inf  ;;  %v935_v43 = vand.u32 2147483648, %v929_v13  ;;  %p1544_p2 = pnand %p1543_p7, %p2044_p12  ;;  %p1551_p1 = por %p1550_p0, %p1549_p11 }
 0x121   : > { %1451 = vrsqrt.f32 %v905_v11  ;;  %vm934_vm14 = vcmp.eq.f32.partialorder %v929_v13, 0.0 }
 0x122   : > { %1453 = vrsqrt.f32 %v929_v13  ;;  %p1545_p9 = pneg %p1544_p2 }
 0x124   : > { %p1552_p8 = pnand %p1551_p1, %p1545_p9 }
 0x12a   : > { %v1444_v14 = vpop.eup %1443 }
 0x12b   : > { %v1446_v16 = vpop.eup %1445  ;;  %v795_v17 = vmul.f32 %v1444_v14, %v793_v60 }
 0x12c   : > { %v827_v19 = vmul.f32 %v1446_v16, %v825_v63  ;;  %v1448_v24 = vpop.eup %1447 }
 0x12d   : > { %v797_v20 = vsel %vm796_vm3, %v793_v60, %v795_v17  ;;  %v1450_v26 = vpop.eup %1449  ;;  %v859_v28 = vmul.f32 %v1448_v24, %v857_v7 }
 0x12e   : > { %v800_v21 = vsel %vm798_vm4, %v799_v15, %v797_v20  ;;  %v829_v22 = vsel %vm828_vm5, %v825_v63, %v827_v19  ;;  %v883_v30 = vmul.f32 %v1450_v26, %v881_v8  ;;  %v1452_v33 = vpop.eup %1451  ;;  %v678_v63 = vstv %s392_s7 }
 0x12f   : > { %v832_v23 = vsel %vm830_vm6, %v831_v18, %v829_v22  ;;  %v861_v32 = vsel %vm860_vm7, %v857_v7, %v859_v28  ;;  %v907_v39 = vmul.f32 %v1452_v33, %v905_v11  ;;  %v1454_v40 = vpop.eup %1453 }
 0x130   : > { %v833_v27 = vadd.f32 %v832_v23, %v800_v21  ;;  %v864_v34 = vsel %vm862_vm8, %v863_v25, %v861_v32  ;;  %v885_v35 = vsel %vm884_vm9, %v881_v8, %v883_v30  ;;  %v931_v46 = vmul.f32 %v1454_v40, %v929_v13 }
 0x131   : > { %v888_v38 = vsel %vm886_vm10, %v887_v29, %v885_v35  ;;  %v909_v42 = vsel %vm908_vm11, %v905_v11, %v907_v39 }
 0x132   : > { %v865_v37 = vadd.f32 %v864_v34, %v833_v27  ;;  %v912_v45 = vsel %vm910_vm12, %v911_v36, %v909_v42  ;;  %v933_v48 = vsel %vm932_vm13, %v929_v13, %v931_v46  ;;  %v724_v46 = vstv %s396_s21 }
 0x133   : > { %v936_v50 = vsel %vm934_vm14, %v935_v43, %v933_v48 }
 0x134   : > { %v889_v41 = vadd.f32 %v888_v38, %v865_v37 }
 0x136   : > { %v913_v47 = vadd.f32 %v912_v45, %v889_v41  ;;  %v720_v41 = vpop.permute.xlu0 %719 }
 0x137   : > { %vm721_vm0 = vcmp.eq.s32.totalorder %v1921_v44, %v720_v41 }
 0x138   : > { %v937_v51 = vadd.f32 %v936_v50, %v913_v47  ;;  %v1232_v47 = vsel %vm721_vm0, 1.0, %v1669_v5  ;;  %v731_v5 = vld [vmem:[#allocation2] sm:$0xff] }
 0x139   : > { %v725_v50 = vmul.f32 %v1232_v47, %v724_v46 }
 0x13a   : > { %v939_v53 = vmul.f32 %v1233_v49, %v937_v51 }
 0x13c   : > { %v940_v54 = vadd.f32 %v939_v53, %v938_v52  ;;  %v727_v53 = vstv %s390_s20 }
 0x13e   : > { %941 = vst [vmem:[#allocation5] sm:$0x1] %v940_v54 }
 0x1c5   : > { %v477_v56 = vpop.f32.mrf.mxu0  ;;  %v542_v58 = vpop.f32.mrf.mxu1 }
 0x1c6   : > { %v478_v61 = vadd.f32 %v1201_v55, %v477_v56  ;;  %v543_v62 = vadd.f32 %v1210_v57, %v542_v58 }
 0x1c7   : > { %v1310_v59 = vpop.f32.mrf.mxu0  ;;  %v1318_v60 = vpop.f32.mrf.mxu1 }
 0x1c8   : > { %v679_v7 = vmul.f32 %v678_v63, %v478_v61  ;;  %v680_v8 = vmul.f32 %v678_v63, %v543_v62  ;;  %v754_v59 = vld [vmem:[#allocation4] sm:$0xff] }
 0x1c9   : > { %v480_v0 = vpop.f32.mrf.mxu0  ;;  %v545_v1 = vpop.f32.mrf.mxu1 }
 0x1ca   : > { %v681_v15 = vmax.f32 %v679_v7, %v680_v8 }
 0x1cb   : > { %v1311_v2 = vpop.f32.mrf.mxu0  ;;  %v1319_v3 = vpop.f32.mrf.mxu1 }
 0x1cd   : > { %v607_v9 = vpop.f32.mrf.mxu0  ;;  %v672_v10 = vpop.f32.mrf.mxu1 }
 0x1ce   : > { %v608_v11 = vadd.f32 %v1219_v4, %v607_v9  ;;  %v673_v12 = vadd.f32 %v1228_v6, %v672_v10  ;;  %v735_v6 = vld [vmem:[#allocation3] sm:$0xff] }
 0x1cf   : > { %v1326_v13 = vpop.f32.mrf.mxu0  ;;  %v1334_v14 = vpop.f32.mrf.mxu1 }
 0x1d0   : > { %v682_v16 = vmul.f32 %v678_v63, %v608_v11  ;;  %v684_v20 = vmul.f32 %v678_v63, %v673_v12 }
 0x1d1   : > { %v610_v17 = vpop.f32.mrf.mxu0  ;;  %v675_v18 = vpop.f32.mrf.mxu1 }
 0x1d2   : > { %v683_v19 = vmax.f32 %v681_v15, %v682_v16  ;;  %v963_v17 = vld [vmem:[#allocation5] sm:$0x1] }
 0x1d3   : > { %v1327_v21 = vpop.f32.mrf.mxu0  ;;  %v1335_v22 = vpop.f32.mrf.mxu1 }
 0x1d4   : > { %v685_v23 = vmax.f32 %v683_v19, %v684_v20  ;;  %v965_v19 = vsel %vm964_vm1, %v963_v17, 0.0 }
 0x1d6   : > { %v686_v24 = vsub.f32 %v679_v7, %v685_v23  ;;  %v692_v25 = vsub.f32 %v680_v8, %v685_v23  ;;  %v698_v26 = vsub.f32 %v682_v16, %v685_v23  ;;  %v704_v27 = vsub.f32 %v684_v20, %v685_v23 }
 0x1d8   : > { %v687_v28 = vmul.f32 1.442695, %v686_v24  ;;  %v693_v29 = vmul.f32 1.442695, %v692_v25  ;;  %v699_v30 = vmul.f32 1.442695, %v698_v26 }
 0x1d9   : > { %v705_v31 = vmul.f32 1.442695, %v704_v27 }
 0x1da   : > { %1455 = vpow2.f32 %v687_v28 }
 0x1db   : > { %1457 = vpow2.f32 %v693_v29 }
 0x1dc   : > { %1459 = vpow2.f32 %v699_v30 }
 0x1dd   : > { %1461 = vpow2.f32 %v705_v31 }
 0x1e7   : > { %v1456_v32 = vpop.eup %1455 }
 0x1e8   : > { %v1458_v33 = vpop.eup %1457  ;;  %v690_v39 = vmul.f32 %v1456_v32, %v478_v61 }
 0x1e9   : > { %v695_v34 = vadd.f32 %v1458_v33, %v1456_v32  ;;  %v1460_v35 = vpop.eup %1459  ;;  %v696_v40 = vmul.f32 %v1458_v33, %v543_v62 }
 0x1ea   : > { %v1462_v37 = vpop.eup %1461  ;;  %v702_v43 = vmul.f32 %v1460_v35, %v608_v11 }
 0x1eb   : > { %v701_v36 = vadd.f32 %v1460_v35, %v695_v34  ;;  %v697_v42 = vadd.f32 %v696_v40, %v690_v39  ;;  %v708_v48 = vmul.f32 %v1462_v37, %v673_v12 }
 0x1ed   : > { %v707_v38 = vadd.f32 %v1462_v37, %v701_v36  ;;  %v703_v45 = vadd.f32 %v702_v43, %v697_v42 }
 0x1ef   : > { %1463 = vrcp.f32 %v707_v38  ;;  %v709_v49 = vadd.f32 %v708_v48, %v703_v45 }
 0x1fc   : > { %v1464_v51 = vpop.eup %1463 }
 0x1fd   : > { %v711_v52 = vmul.f32 %v1464_v51, %v709_v49 }
 0x1ff   : > { %v726_v54 = vsub.f32 %v711_v52, %v725_v50  ;;  %712 = vst [vmem:[%s1937_s17] sm:$0xff] %v711_v52 }
 0x201   : > { %v728_v55 = vmul.f32 %v727_v53, %v726_v54 }
 0x203   : > { %v730_v56 = vsel %vm729_vm15, %v728_v55, -1e+30 }
 0x204   : > { %732 = vmax.xlane.f32.xlu1 %v730_v56  ;;  %v755_v57 = vmul.f32 %v1232_v47, %v730_v56 }
 0x206   : > { %756 = vadd.xlane.f32.xlu0 %v755_v57 }
 0x28d   : > { %v733_v58 = vpop.xlane.xlu1 %732 }
 0x28e   : > { %v734_v60 = vmax.f32 %v731_v5, %v733_v58 }
 0x28f   : > { %v757_v61 = vpop.xlane.xlu0 %756 }
 0x290   : > { %v736_v62 = vsub.f32 %v731_v5, %v734_v60  ;;  %753 = vst.msk [vmem:[#allocation2] sm:$0xff] %vm401_vm2, %v734_v60  ;;  %v758_v63 = vadd.f32 %v757_v61, %v754_v59  ;;  %742 = vperm.xlu1 %1432, %v734_v60  }
 0x292   : > { %759 = vst.msk [vmem:[#allocation4] sm:$0xff] %vm401_vm2, %v758_v63  ;;  %v737_v3 = vmul.f32 1.442695, %v736_v62 }
 0x297   : > { %v945_v13 = vld [vmem:[#allocation2] sm:$0xff] }
 0x299   : > { %v950_v15 = vld [vmem:[#allocation4] sm:$0xff] }
 0x30b   : > { %v743_v0 = vpop.permute.xlu1 %742 }
 0x30c   : > { %v745_v1 = vsub.f32 %v730_v56, %v743_v0 }
 0x30e   : > { %v746_v2 = vmul.f32 1.442695, %v745_v1 }
 0x310   : > { %1465 = vpow2.f32 %v746_v2 }
 0x311   : > { %1467 = vpow2.f32 %v737_v3 }
 0x31d   : > { %v1466_v44 = vpop.eup %1465 }
 0x31e   : > { %748 = vadd.xlane.f32.xlu1 %v1466_v44  ;;  %v1468_v4 = vpop.eup %1467 }
 0x31f   : > { %v739_v7 = vmul.f32 %v1468_v4, %v735_v6 }
 0x3a7   : > { %v749_v8 = vpop.xlane.xlu1 %748 }
 0x3a8   : > { %v750_v9 = vadd.f32 %v749_v8, %v739_v7 }
 0x3aa   : > { %752 = vst.msk [vmem:[#allocation3] sm:$0xff] %vm401_vm2, %v750_v9 }
 0x3b1   : > { %v946_v10 = vld [vmem:[#allocation3] sm:$0xff] }
 0x3b2   : > { %1469 = vlog2.f32 %v946_v10 }
 0x3bf   : > { %v1470_v11 = vpop.eup %1469 }
 0x3c0   : > { %v948_v12 = vmul.f32 0.6931472, %v1470_v11 }
 0x3c2   : > { %v949_v14 = vadd.f32 %v948_v12, %v945_v13 }
 0x3c4   : > { %v951_v16 = vsub.f32 %v949_v14, %v950_v15 }
 0x3c6   : > { %v952_v18 = vsel %vm401_vm2, %v951_v16, 0.0 }
 0x3c7   : > { %953 = vadd.xlane.f32.xlu1 %v952_v18 }
 0x3cb   : > { %966 = vadd.xlane.f32.xlu1 %v965_v19 }
 0x3cc   : > { %1555 = shalt.err (!%p1552_p8)
}
 0x3cd   : > { %s1556_s8 = scalar_lea.hbm %s1010_s14, 128  ;;  %s1560_s13 = scalar_lea.hbm %s2018_s6, 256 }
 0x3ce   : > { %p1557_p13 = scmp.ne.s32.totalorder %s1010_s14, %s1556_s8  ;;  %p1561_p10 = scmp.lt.s32.totalorder %s1010_s14, %s2018_s6 }
 0x3cf   : > { %p1562_p5 = scmp.lt.s32.totalorder %s1560_s13, %s1556_s8 }
 0x3d0   : > { %p1558_p4 = pnand %p1557_p13, %p2044_p12 }
 0x3d1   : > { %p1563_p3 = por %p1562_p5, %p1561_p10 }
 0x3d2   : > { %p1559_p6 = pneg %p1558_p4 }
 0x3d4   : > { %p1564_p7 = pnand %p1563_p3, %p1559_p6 }
 0x3d6   : > { %1567 = shalt.err (!%p1564_p7)
}
 0x3d7   : > { %1349 = dma.vmem_to_hbm [thread:$0]  (%p2044_p12), %s1013_s15, 128, %s1010_s14, %s985_s26  }
 0x3d8   : > { %s393_s21 = sadd.s32 2, %s1919_s27  ;;  %s1247_s14 = sshll.u32 %s1652_s24, 4 }
 0x3d9   : > { %s394_s20 = sld [smem:[#allocation6 + %s393_s21]]  ;;  %s372_s26 = scalar_lea.vmem [#allocation13], %s1849_s2 }
 0x3da   : > { %s998_s29 = sshll.u32 %s372_s26, 4  ;;  %s1970_s8 = scalar_lea.hbm %s2017_s5, %s1247_s14  ;;  %s999_s29 = int_to_ptr.vmem [resolvable:$true] %s998_s29 }
 0x3db   : > { %s981_s27 = scalar_lea.sflag [#allocation8], %s1849_s2  ;;  %s1568_s16 = scalar_lea.vmem %s999_s29, 16 }
 0x3dc   : > { %p1569_p2 = scmp.ne.s32.totalorder %s999_s29, %s1568_s16  ;;  %s1674_s18 = smov [#allocation13]  }
 0x3dd   : > { %s1572_s24 = sshll.u32 %s1674_s18, 4  ;;  %s1573_s24 = int_to_ptr.vmem [resolvable:$false] %s1572_s24 }
 0x3de   : > { %p1570_p9 = pnand %p1569_p2, %p2044_p12  ;;  %s1574_s13 = scalar_lea.vmem %s1573_s24, 32 }
 0x3df   : > { %p1575_p0 = scmp.lt.s32.totalorder %s999_s29, %s1573_s24  ;;  %p1576_p1 = scmp.lt.s32.totalorder %s1574_s13, %s1568_s16 }
 0x3e0   : > { %p1571_p11 = pneg %p1570_p9 }
 0x3e1   : > { %p1577_p8 = por %p1576_p1, %p1575_p0 }
 0x3e3   : > { %p1578_p13 = pnand %p1577_p8, %p1571_p11 }
 0x450   : > { %v954_v20 = vpop.xlane.xlu1 %953 }
 0x451   : > { %v955_v21 = vrot.slane %v954_v20, 4 }
 0x453   : > { %v956_v22 = vadd.f32 %v955_v21, %v954_v20 }
 0x454   : > { %v967_v23 = vpop.xlane.xlu1 %966 }
 0x455   : > { %v957_v24 = vrot.slane %v956_v22, 2  ;;  %v968_v25 = vrot.slane %v967_v23, 4 }
 0x457   : > { %v969_v26 = vadd.f32 %v968_v25, %v967_v23  ;;  %v958_v27 = vadd.f32 %v957_v24, %v956_v22 }
 0x459   : > { %v970_v28 = vrot.slane %v969_v26, 2  ;;  %v959_v29 = vrot.slane %v958_v27, 1 }
 0x45b   : > { %v971_v30 = vadd.f32 %v970_v28, %v969_v26  ;;  %v960_v31 = vadd.f32 %v959_v29, %v958_v27 }
 0x45d   : > { %1336 = vpush %v960_v31  ;;  %v972_v32 = vrot.slane %v971_v30, 1 }
 0x45f   : > { %v973_v33 = vadd.f32 %v972_v32, %v971_v30 }
 0x461   : > { %1338 = vpush %v973_v33 }
 0x48e   : > { %s1337_s10 = spop %1336 }
 0x48f   : > { %s962_s30 = smul.f32 0.125, %s1337_s10 }
 0x492   : > { %s1339_s17 = spop %1338 }
 0x493   : > { %s975_s19 = smul.f32 0.010416667, %s1339_s17 }
 0x495   : > { %s976_s15 = smul.f32 %s975_s19, %s394_s20 }
 0x497   : > { %s977_s28 = sadd.f32 %s976_s15, %s962_s30 }
 0x499   : > { %v978_v34 = vstv %s977_s28 }
 0x49a   : > { %979 = vst [vmem:[%s372_s26] sm:$0x1] %v978_v34 }
 0x49b   : > { %1581 = shalt.err (!%p1578_p13)
}
 0x49c   : > { %s1582_s7 = scalar_lea.hbm %s1970_s8, 16  ;;  %s1586_s21 = scalar_lea.hbm %s2017_s5, 32 }
 0x49d   : > { %p1583_p4 = scmp.ne.s32.totalorder %s1970_s8, %s1582_s7  ;;  %p1587_p5 = scmp.lt.s32.totalorder %s1970_s8, %s2017_s5 }
 0x49e   : > { %p1588_p3 = scmp.lt.s32.totalorder %s1586_s21, %s1582_s7 }
 0x49f   : > { %p1584_p6 = pnand %p1583_p4, %p2044_p12 }
 0x4a0   : > { %p1589_p7 = por %p1588_p3, %p1587_p5 }
 0x4a1   : > { %p1585_p10 = pneg %p1584_p6 }
 0x4a3   : > { %p1590_p2 = pnand %p1589_p7, %p1585_p10 }
 0x4a5   : > { %1593 = shalt.err (!%p1590_p2)
}
 0x4a6   : > { %1348 = dma.vmem_to_hbm [thread:$0]  (%p2044_p12), %s999_s29, 16, %s1970_s8, %s981_s27  }
 0x4a7 PF: > { %s2045_s17 = sld [smem:[#allocation21_spill]] }
 0x4a8   : > { %s2046_s19 = sld [smem:[#allocation23_spill]] }
 0x4a9   : > { %s2047_s30 = sld [smem:[#allocation22_spill]] }
 0x4ad   : > { %s1024_s14 = sand.u32 1, %s2045_s17  }
 0x4ae   : > { %p2048_p9 = scmp.ne.s32.totalorder %s2046_s19, 0  ;;  %s1025_s15 = scalar_lea.sflag [#allocation8], %s1024_s14 }
 0x4af   : > { %p2049_p11 = scmp.ge.s32.totalorder %s2047_s30, 2 }
 0x4b1   : > { %p1364_p0 = pnand %p2049_p11, %p2048_p9 }
 0x4b3   : > { %p1365_p1 = pneg %p1364_p0 }
 0x4b5   : > { %1631 = dma.done.wait (%p1365_p1), %s1025_s15, 16  }
 0x4b6   : > { %1633 = vsyncadd (%p1365_p1), %s1025_s15, 4294967280  ;;  %s1033_s26 = scalar_lea.sflag [#allocation15], %s1024_s14 }
 0x4b7   : > { %1635 = dma.done.wait (%p1365_p1), %s1033_s26, 128  }
 0x4b8   : > { %1637 = vsyncadd (%p1365_p1), %s1033_s26, 4294967168  ;;  %s30_s26 = sadd.s32 1, %s2047_s30   ;;  %s2050_s9 = sld [smem:[#allocation25_spill]] }
 0x4b9   : > { %p27_p8 = scmp.ge.s32.totalorder %s30_s26, 4   ;;  %s2051_s29 = sld [smem:[#allocation24_spill]] }
 0x4ba   : > { %s2052_s21 = smov %s1644_s22  ;;  %s2053_s22 = smov %s1648_s23 }
 0x4bb   : > { %s2055_s24 = smov %s1656_s25  ;;  %29 = sbr.rel (!%p27_p8) target bundleno = 14 (0xe), region = 140 }
 0x4be   : > { %s2054_s23 = smov %s2050_s9 }
 0x4bf   : > { %s2056_s25 = smov %s2051_s29 }
 0x4c0   :  { %1038 = vsyncpa [#allocation7], 1 }
 0x4c1   :  { %1040 = vsyncpa [#allocation7 + $0x1], 1 }
 0x4c2   :  { %1041 = vsyncpa [#allocation12], 1 }
 0x4c3   :  { %1043 = vsyncpa [#allocation12 + $0x1], 1 }
 0x4c4   :  { %1044 = vsyncpa [#allocation8], 1 }
 0x4c5   :  { %1046 = vsyncpa [#allocation8 + $0x1], 1 }
 0x4c6   :  { %1047 = vsyncpa [#allocation15], 1 }
 0x4c7   :  { %1049 = vsyncpa [#allocation15 + $0x1], 1 }
 0x4c8   :  { %1050 = vsyncpa [#allocation9], 1 }
 0x4c9   :  { %1052 = vsyncpa [#allocation9 + $0x1], 1 }

</bundles_post_ra>
